<compile_context>
chip_gen: v7x
topology: tpu7x:2x2x1
jax: 0.10.0
libtpu: 0.0.40
codegen_flags: <defaults>
</compile_context>

<pallas_src>
import functools

import jax
import jax.numpy as jnp
from jax.experimental import pallas as pl
from jax.experimental.pallas import tpu as pltpu


# ----------------------------------------------------------------------------
# Fused Pallas kernel: all conv layers for one batch element
# ----------------------------------------------------------------------------
def _fcn_fused_kernel(*refs, layers, H, W, k):
    # refs = (x, mask, w0, b0, ..., w_{L-1}, b_{L-1}, out, act_scratch, patch_scratch)
    nl = len(layers)
    x_ref, mask_ref = refs[0], refs[1]
    w_refs = [refs[2 + 2 * i] for i in range(nl)]
    b_refs = [refs[3 + 2 * i] for i in range(nl)]
    o_ref = refs[2 + 2 * nl]
    a_ref = refs[3 + 2 * nl]   # (C_max, L)  bf16 flat padded activation (+ margins)
    p_ref = refs[4 + 2 * nl]   # (K_max, S)  bf16 im2col patch matrix

    pad = (k - 1) // 2
    Hp, Wp = H + 2 * pad, W + 2 * pad
    S = Hp * Wp
    M = pad * (Wp + 1)          # margin so every shifted slice stays in-bounds

    # Stage the (already padded + flattened) input into the activation scratch.
    # Zero-init once so the margin region is well defined.
    a_ref[...] = jnp.zeros_like(a_ref)
    c0 = layers[0][0]
    a_ref[0:c0, :] = x_ref[0]

    for li, (cin, cout, relu) in enumerate(layers):
        # ---- im2col gather: k*k shifted lane-slices of the flat activation --
        for dh in range(k):
            for dw in range(k):
                j = dh * k + dw
                s = (dh - pad) * Wp + (dw - pad)
                p_ref[j * cin:(j + 1) * cin, :] = a_ref[0:cin, M + s:M + s + S]

        kk = k * k * cin
        # ---- single lane-dense MXU matmul, f32 accumulation ------------------
        acc = jnp.dot(w_refs[li][...], p_ref[0:kk, :],
                      preferred_element_type=jnp.float32)        # (cout, S)
        acc = acc + b_refs[li][...]                              # (cout, 1) bcast
        if relu:
            acc = jnp.maximum(acc, 0.0)
        # Zero the halo columns so they act as 'same' zero padding next layer.
        acc = acc * mask_ref[...]                                # (1, S) bcast

        if li + 1 < nl:
            a_ref[0:cout, M:M + S] = acc.astype(a_ref.dtype)
        else:
            o_ref[0] = acc.astype(o_ref.dtype)
        # TODO(synk): nn.Dropout(p=0.2) after the early conv layers is identity
        # at inference time; training-mode dropout is not implemented.


# ----------------------------------------------------------------------------
# Wrapper: NCHW in / NCHW out, one pallas_call for the whole network
# ----------------------------------------------------------------------------
def fcn_forward(x_nchw, params):
    """Forward pass matching FCN.forward (eval mode). x: (N, Cin, H, W) f32."""
    N, C0, H, W = x_nchw.shape
    nl = len(params)
    k = params[0]["k"]
    assert all(p["k"] == k and p["k"] % 2 == 1 for p in params), \
        "fused kernel assumes a single odd kernel size for all layers"
    assert params[0]["cin"] == C0

    pad = (k - 1) // 2
    Hp, Wp = H + 2 * pad, W + 2 * pad
    S = Hp * Wp
    M = pad * (Wp + 1)
    L = S + 2 * M
    c_last = params[-1]["cout"]
    c_max = max(max(p["cin"], p["cout"]) for p in params)
    k_rows = max(k * k * p["cin"] for p in params)
    layers_cfg = tuple((p["cin"], p["cout"], p["relu"]) for p in params)

    # --- glue (once per call): NCHW -> channel-major, zero-padded, flattened --
    xp = jnp.pad(x_nchw, ((0, 0), (0, 0), (pad, pad), (pad, pad)))  # (N,C0,Hp,Wp)
    xf = jnp.pad(xp.reshape(N, C0, S), ((0, 0), (0, 0), (M, M)))    # (N,C0,L)
    xf = xf.astype(jnp.bfloat16)

    # Interior mask over the flattened padded grid (1 = real pixel, 0 = halo).
    yy, xx = jnp.meshgrid(jnp.arange(Hp), jnp.arange(Wp), indexing="ij")
    interior = ((yy >= pad) & (yy < pad + H) & (xx >= pad) & (xx < pad + W))
    mask = interior.reshape(1, S).astype(jnp.float32)

    inputs = [xf, mask]
    in_specs = [
        pl.BlockSpec((1, C0, L), lambda n: (n, 0, 0)),
        pl.BlockSpec((1, S), lambda n: (0, 0)),
    ]
    for p in params:
        inputs += [p["w_mat"], p["b_col"]]
        in_specs += [pl.BlockSpec(p["w_mat"].shape, lambda n: (0, 0)),
                     pl.BlockSpec(p["b_col"].shape, lambda n: (0, 0))]

    # Loose VMEM budget check (everything here is a few hundred KB).
    vmem_bytes = (2 * C0 * L * 2 + 2 * c_last * S * 4            # double-buffered I/O
                  + c_max * L * 2 + k_rows * S * 2               # scratch
                  + sum(p["w_mat"].size * 2 + p["b_col"].size * 4 for p in params))
    assert vmem_bytes < 8 * 1024 * 1024, (
        "activation block too large for a single fused VMEM-resident pass; "
        "TODO(synk): add spatial (H) tiling with a k-1 halo for large images")

    kern = functools.partial(_fcn_fused_kernel, layers=layers_cfg, H=H, W=W, k=k)
    out_flat = pl.pallas_call(
        kern,
        out_shape=jax.ShapeDtypeStruct((N, c_last, S), jnp.float32),
        grid_spec=pltpu.PrefetchScalarGridSpec(
            num_scalar_prefetch=0,
            grid=(N,),
            in_specs=in_specs,
            out_specs=pl.BlockSpec((1, c_last, S), lambda n: (n, 0, 0)),
            scratch_shapes=[
                pltpu.VMEM((c_max, L), jnp.bfloat16),   # persistent activation
                pltpu.VMEM((k_rows, S), jnp.bfloat16),  # im2col patch matrix
            ],
        ),
        compiler_params=pltpu.CompilerParams(
            dimension_semantics=("parallel",)),
    )(*inputs)

    # --- glue: drop the padding halo, back to NCHW ----------------------------
    out = out_flat.reshape(N, c_last, Hp, Wp)[:, :, pad:pad + H, pad:pad + W]
    return out


# ----------------------------------------------------------------------------
# Deterministic parameter construction (xavier_normal, like _initialize_weights)
# ----------------------------------------------------------------------------
def _xavier_normal(key, shape):
    d0, d1, kh, kw = shape
    fan_in, fan_out = d1 * kh * kw, d0 * kh * kw
    std = (2.0 / (fan_in + fan_out)) ** 0.5
    return std * jax.random.normal(key, shape, jnp.float32)


def _make_layer(w_hwio, b, relu):
    kk, _, cin, cout = w_hwio.shape
    # matmul-ready weight: (Cout, k*k*Cin) with row blocks ordered (dh, dw, ci)
    w_mat = (jnp.transpose(w_hwio, (3, 0, 1, 2))
             .reshape(cout, kk * kk * cin).astype(jnp.bfloat16))
    return dict(w_hwio=w_hwio, b=b, w_mat=w_mat,
                b_col=b.reshape(cout, 1).astype(jnp.float32),
                relu=relu, cin=cin, cout=cout, k=kk)


def init_fcn_params(key, input_dim, filter_sizes, upfilter_sizes):
    params = []
    prev_c = input_dim[0]
    # Conv2d stack: every conv is followed by ReLU (+ inference-identity dropout).
    for (cout, kk) in filter_sizes:
        key, wk, bk = jax.random.split(key, 3)
        w_oihw = _xavier_normal(wk, (cout, prev_c, kk, kk))
        b = 0.01 * jax.random.normal(bk, (cout,), jnp.float32)
        w_hwio = jnp.transpose(w_oihw, (2, 3, 1, 0))            # OIHW -> HWIO
        params.append(_make_layer(w_hwio, b, relu=True))
        prev_c = cout
    # ConvTranspose2d stack.  NOTE: the PyTorch module gates the ReLU with
    # `i < len(upfilter_size) - 1`, where upfilter_size is the PER-LAYER
    # 2-tuple (i.e. ReLU only after the first transpose conv); we reproduce
    # that exact behavior to keep forward-pass semantics.
    for i, upfilter_size in enumerate(upfilter_sizes):
        cout, kk = upfilter_size
        key, wk, bk = jax.random.split(key, 3)
        w_iokk = _xavier_normal(wk, (prev_c, cout, kk, kk))     # (Cin, Cout, k, k)
        b = 0.01 * jax.random.normal(bk, (cout,), jnp.float32)
        # ConvTranspose2d(stride=1, pad=(k-1)//2) == same-pad Conv2d with the
        # channel-transposed, spatially flipped weight.
        w_hwio = jnp.flip(jnp.transpose(w_iokk, (2, 3, 0, 1)), axis=(0, 1))
        params.append(_make_layer(w_hwio, b, relu=(i < len(upfilter_size) - 1)))
        prev_c = cout
    # TODO(synk): optional output_act (softmax) / mlp head are None in this
    # configuration and therefore not implemented.
    return params


# ----------------------------------------------------------------------------
# Pure-JAX f32 reference (for correctness check of the fused kernel)
# ----------------------------------------------------------------------------
def fcn_reference(x_nchw, params):
    x = jnp.transpose(x_nchw, (0, 2, 3, 1))                     # NHWC
    for p in params:
        x = jax.lax.conv_general_dilated(
            x, p["w_hwio"], window_strides=(1, 1), padding="SAME",
            dimension_numbers=("NHWC", "HWIO", "NHWC"))
        x = x + p["b"]
        if p["relu"]:
            x = jnp.maximum(x, 0.0)
    return jnp.transpose(x, (0, 3, 1, 2))                        # NCHW


if __name__ == "__main__":
    key = jax.random.PRNGKey(0)
    key, xk = jax.random.split(key)

    # Small config consistent with the module's constructor:
    #   input_dim=(4, 3), filter_sizes=[(8,3),(8,3)], upfilter_sizes=[(4,3),(2,3)]
    N, Cin, H, W = 2, 4, 16, 16
    input_dim = (Cin, 3)
    filter_sizes = [(8, 3), (8, 3)]
    upfilter_sizes = [(4, 3), (2, 3)]

    x = jax.random.normal(xk, (N, Cin, H, W), jnp.float32)
    params = init_fcn_params(key, input_dim, filter_sizes, upfilter_sizes)

    out = fcn_forward(x, params)
    jax.block_until_ready(out)

    assert out.shape == (N, upfilter_sizes[-1][0], H, W), out.shape
    assert out.dtype == jnp.float32

    ref = fcn_reference(x, params)
    max_err = float(jnp.max(jnp.abs(out - ref)))
    # bf16 MXU inputs with f32 accumulation across 4 small layers
    assert max_err < 1e-1, f"mismatch vs f32 reference: max|err| = {max_err}"

    print("KERNEL_OK")
</pallas_src>

<mosaic_0001>
module attributes {stable_mosaic.version = 11 : i64} {
  func.func @_fcn_fused_kernel(%arg0: i32, %arg1: memref<1x4x362xbf16, #tpu.memory_space<vmem>>, %arg2: memref<1x324xf32, #tpu.memory_space<vmem>>, %arg3: memref<8x36xbf16, #tpu.memory_space<vmem>>, %arg4: memref<8x1xf32, #tpu.memory_space<vmem>>, %arg5: memref<8x72xbf16, #tpu.memory_space<vmem>>, %arg6: memref<8x1xf32, #tpu.memory_space<vmem>>, %arg7: memref<4x72xbf16, #tpu.memory_space<vmem>>, %arg8: memref<4x1xf32, #tpu.memory_space<vmem>>, %arg9: memref<2x36xbf16, #tpu.memory_space<vmem>>, %arg10: memref<2x1xf32, #tpu.memory_space<vmem>>, %arg11: memref<1x2x324xf32, #tpu.memory_space<vmem>>, %arg12: memref<8x362xbf16, #tpu.memory_space<vmem>>, %arg13: memref<72x324xbf16, #tpu.memory_space<vmem>>) attributes {dimension_semantics = [#tpu.dimension_semantics<parallel>], iteration_bounds = array<i64: 2>, scalar_prefetch = 0 : i64, scratch_operands = 2 : i64, tpu.core_type = #tpu.core_type<tc>, window_params = [{transform_indices = @transform_0, window_bounds = array<i64: 1, 4, 362>}, {pipeline_mode = #tpu.pipeline_mode<synchronous>, transform_indices = @transform_1, window_bounds = array<i64: 1, 324>}, {pipeline_mode = #tpu.pipeline_mode<synchronous>, transform_indices = @transform_2, window_bounds = array<i64: 8, 36>}, {pipeline_mode = #tpu.pipeline_mode<synchronous>, transform_indices = @transform_3, window_bounds = array<i64: 8, 1>}, {pipeline_mode = #tpu.pipeline_mode<synchronous>, transform_indices = @transform_4, window_bounds = array<i64: 8, 72>}, {pipeline_mode = #tpu.pipeline_mode<synchronous>, transform_indices = @transform_5, window_bounds = array<i64: 8, 1>}, {pipeline_mode = #tpu.pipeline_mode<synchronous>, transform_indices = @transform_6, window_bounds = array<i64: 4, 72>}, {pipeline_mode = #tpu.pipeline_mode<synchronous>, transform_indices = @transform_7, window_bounds = array<i64: 4, 1>}, {pipeline_mode = #tpu.pipeline_mode<synchronous>, transform_indices = @transform_8, window_bounds = array<i64: 2, 36>}, {pipeline_mode = #tpu.pipeline_mode<synchronous>, transform_indices = @transform_9, window_bounds = array<i64: 2, 1>}, {transform_indices = @transform_10, window_bounds = array<i64: 1, 2, 324>}]} {
    %cst = arith.constant 0.000000e+00 : bf16
    %0 = vector.broadcast %cst : bf16 to vector<8x362xbf16>
    %c0 = arith.constant 0 : index
    %c0_0 = arith.constant 0 : index
    %1 = vector.load %arg12[%c0, %c0_0] : memref<8x362xbf16, #tpu.memory_space<vmem>>, vector<8x362xbf16>
    tpu.vector_store %arg12[%c0, %c0_0], %0 {strides = array<i32>} : memref<8x362xbf16, #tpu.memory_space<vmem>>, vector<8x362xbf16>,
    %c0_1 = arith.constant 0 : index
    %c0_2 = arith.constant 0 : index
    %c0_3 = arith.constant 0 : index
    %2 = vector.load %arg1[%c0_1, %c0_2, %c0_3] : memref<1x4x362xbf16, #tpu.memory_space<vmem>>, vector<1x4x362xbf16>
    %3 = vector.shape_cast %2 : vector<1x4x362xbf16> to vector<4x362xbf16>
    %c0_4 = arith.constant 0 : index
    %c0_5 = arith.constant 0 : index
    %4 = vector.load %arg12[%c0_4, %c0_5] : memref<8x362xbf16, #tpu.memory_space<vmem>>, vector<4x362xbf16>
    tpu.vector_store %arg12[%c0_4, %c0_5], %3 {strides = array<i32>} : memref<8x362xbf16, #tpu.memory_space<vmem>>, vector<4x362xbf16>,
    %c0_6 = arith.constant 0 : index
    %c0_7 = arith.constant 0 : index
    %5 = vector.load %arg12[%c0_6, %c0_7] : memref<8x362xbf16, #tpu.memory_space<vmem>>, vector<4x324xbf16>
    %c0_8 = arith.constant 0 : index
    %c0_9 = arith.constant 0 : index
    %6 = vector.load %arg13[%c0_8, %c0_9] : memref<72x324xbf16, #tpu.memory_space<vmem>>, vector<4x324xbf16>
    tpu.vector_store %arg13[%c0_8, %c0_9], %5 {strides = array<i32>} : memref<72x324xbf16, #tpu.memory_space<vmem>>, vector<4x324xbf16>,
    %c0_10 = arith.constant 0 : index
    %c1 = arith.constant 1 : index
    %7 = vector.load %arg12[%c0_10, %c1] : memref<8x362xbf16, #tpu.memory_space<vmem>>, vector<4x324xbf16>
    %c4 = arith.constant 4 : index
    %c0_11 = arith.constant 0 : index
    %8 = vector.load %arg13[%c4, %c0_11] : memref<72x324xbf16, #tpu.memory_space<vmem>>, vector<4x324xbf16>
    tpu.vector_store %arg13[%c4, %c0_11], %7 {strides = array<i32>} : memref<72x324xbf16, #tpu.memory_space<vmem>>, vector<4x324xbf16>,
    %c0_12 = arith.constant 0 : index
    %c2 = arith.constant 2 : index
    %9 = vector.load %arg12[%c0_12, %c2] : memref<8x362xbf16, #tpu.memory_space<vmem>>, vector<4x324xbf16>
    %c8 = arith.constant 8 : index
    %c0_13 = arith.constant 0 : index
    %10 = vector.load %arg13[%c8, %c0_13] : memref<72x324xbf16, #tpu.memory_space<vmem>>, vector<4x324xbf16>
    tpu.vector_store %arg13[%c8, %c0_13], %9 {strides = array<i32>} : memref<72x324xbf16, #tpu.memory_space<vmem>>, vector<4x324xbf16>,
    %c0_14 = arith.constant 0 : index
    %c18 = arith.constant 18 : index
    %11 = vector.load %arg12[%c0_14, %c18] : memref<8x362xbf16, #tpu.memory_space<vmem>>, vector<4x324xbf16>
    %c12 = arith.constant 12 : index
    %c0_15 = arith.constant 0 : index
    %12 = vector.load %arg13[%c12, %c0_15] : memref<72x324xbf16, #tpu.memory_space<vmem>>, vector<4x324xbf16>
    tpu.vector_store %arg13[%c12, %c0_15], %11 {strides = array<i32>} : memref<72x324xbf16, #tpu.memory_space<vmem>>, vector<4x324xbf16>,
    %c0_16 = arith.constant 0 : index
    %c19 = arith.constant 19 : index
    %13 = vector.load %arg12[%c0_16, %c19] : memref<8x362xbf16, #tpu.memory_space<vmem>>, vector<4x324xbf16>
    %c16 = arith.constant 16 : index
    %c0_17 = arith.constant 0 : index
    %14 = vector.load %arg13[%c16, %c0_17] : memref<72x324xbf16, #tpu.memory_space<vmem>>, vector<4x324xbf16>
    tpu.vector_store %arg13[%c16, %c0_17], %13 {strides = array<i32>} : memref<72x324xbf16, #tpu.memory_space<vmem>>, vector<4x324xbf16>,
    %c0_18 = arith.constant 0 : index
    %c20 = arith.constant 20 : index
    %15 = vector.load %arg12[%c0_18, %c20] : memref<8x362xbf16, #tpu.memory_space<vmem>>, vector<4x324xbf16>
    %c20_19 = arith.constant 20 : index
    %c0_20 = arith.constant 0 : index
    %16 = vector.load %arg13[%c20_19, %c0_20] : memref<72x324xbf16, #tpu.memory_space<vmem>>, vector<4x324xbf16>
    tpu.vector_store %arg13[%c20_19, %c0_20], %15 {strides = array<i32>} : memref<72x324xbf16, #tpu.memory_space<vmem>>, vector<4x324xbf16>,
    %c0_21 = arith.constant 0 : index
    %c36 = arith.constant 36 : index
    %17 = vector.load %arg12[%c0_21, %c36] : memref<8x362xbf16, #tpu.memory_space<vmem>>, vector<4x324xbf16>
    %c24 = arith.constant 24 : index
    %c0_22 = arith.constant 0 : index
    %18 = vector.load %arg13[%c24, %c0_22] : memref<72x324xbf16, #tpu.memory_space<vmem>>, vector<4x324xbf16>
    tpu.vector_store %arg13[%c24, %c0_22], %17 {strides = array<i32>} : memref<72x324xbf16, #tpu.memory_space<vmem>>, vector<4x324xbf16>,
    %c0_23 = arith.constant 0 : index
    %c37 = arith.constant 37 : index
    %19 = vector.load %arg12[%c0_23, %c37] : memref<8x362xbf16, #tpu.memory_space<vmem>>, vector<4x324xbf16>
    %c28 = arith.constant 28 : index
    %c0_24 = arith.constant 0 : index
    %20 = vector.load %arg13[%c28, %c0_24] : memref<72x324xbf16, #tpu.memory_space<vmem>>, vector<4x324xbf16>
    tpu.vector_store %arg13[%c28, %c0_24], %19 {strides = array<i32>} : memref<72x324xbf16, #tpu.memory_space<vmem>>, vector<4x324xbf16>,
    %c0_25 = arith.constant 0 : index
    %c38 = arith.constant 38 : index
    %21 = vector.load %arg12[%c0_25, %c38] : memref<8x362xbf16, #tpu.memory_space<vmem>>, vector<4x324xbf16>
    %c32 = arith.constant 32 : index
    %c0_26 = arith.constant 0 : index
    %22 = vector.load %arg13[%c32, %c0_26] : memref<72x324xbf16, #tpu.memory_space<vmem>>, vector<4x324xbf16>
    tpu.vector_store %arg13[%c32, %c0_26], %21 {strides = array<i32>} : memref<72x324xbf16, #tpu.memory_space<vmem>>, vector<4x324xbf16>,
    %c0_27 = arith.constant 0 : index
    %c0_28 = arith.constant 0 : index
    %23 = vector.load %arg3[%c0_27, %c0_28] : memref<8x36xbf16, #tpu.memory_space<vmem>>, vector<8x36xbf16>
    %c0_29 = arith.constant 0 : index
    %c0_30 = arith.constant 0 : index
    %24 = vector.load %arg13[%c0_29, %c0_30] : memref<72x324xbf16, #tpu.memory_space<vmem>>, vector<36x324xbf16>
    %cst_31 = arith.constant dense<0.000000e+00> : vector<8x324xf32>
    %25 = tpu.matmul %23, %24, %cst_31 {dimension_numbers = #tpu.dot_dimension_numbers<[1], [0], [0], [1], [0, 0, 1, 1], [], []>} : vector<8x36xbf16>, vector<36x324xbf16>, vector<8x324xf32> -> vector<8x324xf32>
    %c0_32 = arith.constant 0 : index
    %c0_33 = arith.constant 0 : index
    %26 = vector.load %arg4[%c0_32, %c0_33] : memref<8x1xf32, #tpu.memory_space<vmem>>, vector<8x1xf32>
    %27 = vector.broadcast %26 : vector<8x1xf32> to vector<8x324xf32>
    %28 = arith.addf %25, %27 : vector<8x324xf32>
    %cst_34 = arith.constant 0.000000e+00 : f32
    %29 = vector.broadcast %cst_34 : f32 to vector<8x324xf32>
    %30 = arith.maximumf %28, %29 : vector<8x324xf32>
    %c0_35 = arith.constant 0 : index
    %c0_36 = arith.constant 0 : index
    %31 = vector.load %arg2[%c0_35, %c0_36] : memref<1x324xf32, #tpu.memory_space<vmem>>, vector<1x324xf32>
    %32 = vector.broadcast %31 : vector<1x324xf32> to vector<8x324xf32>
    %33 = arith.mulf %30, %32 : vector<8x324xf32>
    %34 = arith.truncf %33 : vector<8x324xf32> to vector<8x324xbf16>
    %c0_37 = arith.constant 0 : index
    %c19_38 = arith.constant 19 : index
    %35 = vector.load %arg12[%c0_37, %c19_38] : memref<8x362xbf16, #tpu.memory_space<vmem>>, vector<8x324xbf16>
    tpu.vector_store %arg12[%c0_37, %c19_38], %34 {strides = array<i32>} : memref<8x362xbf16, #tpu.memory_space<vmem>>, vector<8x324xbf16>,
    %c0_39 = arith.constant 0 : index
    %c0_40 = arith.constant 0 : index
    %36 = vector.load %arg12[%c0_39, %c0_40] : memref<8x362xbf16, #tpu.memory_space<vmem>>, vector<8x324xbf16>
    %c0_41 = arith.constant 0 : index
    %c0_42 = arith.constant 0 : index
    %37 = vector.load %arg13[%c0_41, %c0_42] : memref<72x324xbf16, #tpu.memory_space<vmem>>, vector<8x324xbf16>
    tpu.vector_store %arg13[%c0_41, %c0_42], %36 {strides = array<i32>} : memref<72x324xbf16, #tpu.memory_space<vmem>>, vector<8x324xbf16>,
    %c0_43 = arith.constant 0 : index
    %c1_44 = arith.constant 1 : index
    %38 = vector.load %arg12[%c0_43, %c1_44] : memref<8x362xbf16, #tpu.memory_space<vmem>>, vector<8x324xbf16>
    %c8_45 = arith.constant 8 : index
    %c0_46 = arith.constant 0 : index
    %39 = vector.load %arg13[%c8_45, %c0_46] : memref<72x324xbf16, #tpu.memory_space<vmem>>, vector<8x324xbf16>
    tpu.vector_store %arg13[%c8_45, %c0_46], %38 {strides = array<i32>} : memref<72x324xbf16, #tpu.memory_space<vmem>>, vector<8x324xbf16>,
    %c0_47 = arith.constant 0 : index
    %c2_48 = arith.constant 2 : index
    %40 = vector.load %arg12[%c0_47, %c2_48] : memref<8x362xbf16, #tpu.memory_space<vmem>>, vector<8x324xbf16>
    %c16_49 = arith.constant 16 : index
    %c0_50 = arith.constant 0 : index
    %41 = vector.load %arg13[%c16_49, %c0_50] : memref<72x324xbf16, #tpu.memory_space<vmem>>, vector<8x324xbf16>
    tpu.vector_store %arg13[%c16_49, %c0_50], %40 {strides = array<i32>} : memref<72x324xbf16, #tpu.memory_space<vmem>>, vector<8x324xbf16>,
    %c0_51 = arith.constant 0 : index
    %c18_52 = arith.constant 18 : index
    %42 = vector.load %arg12[%c0_51, %c18_52] : memref<8x362xbf16, #tpu.memory_space<vmem>>, vector<8x324xbf16>
    %c24_53 = arith.constant 24 : index
    %c0_54 = arith.constant 0 : index
    %43 = vector.load %arg13[%c24_53, %c0_54] : memref<72x324xbf16, #tpu.memory_space<vmem>>, vector<8x324xbf16>
    tpu.vector_store %arg13[%c24_53, %c0_54], %42 {strides = array<i32>} : memref<72x324xbf16, #tpu.memory_space<vmem>>, vector<8x324xbf16>,
    %c0_55 = arith.constant 0 : index
    %c19_56 = arith.constant 19 : index
    %44 = vector.load %arg12[%c0_55, %c19_56] : memref<8x362xbf16, #tpu.memory_space<vmem>>, vector<8x324xbf16>
    %c32_57 = arith.constant 32 : index
    %c0_58 = arith.constant 0 : index
    %45 = vector.load %arg13[%c32_57, %c0_58] : memref<72x324xbf16, #tpu.memory_space<vmem>>, vector<8x324xbf16>
    tpu.vector_store %arg13[%c32_57, %c0_58], %44 {strides = array<i32>} : memref<72x324xbf16, #tpu.memory_space<vmem>>, vector<8x324xbf16>,
    %c0_59 = arith.constant 0 : index
    %c20_60 = arith.constant 20 : index
    %46 = vector.load %arg12[%c0_59, %c20_60] : memref<8x362xbf16, #tpu.memory_space<vmem>>, vector<8x324xbf16>
    %c40 = arith.constant 40 : index
    %c0_61 = arith.constant 0 : index
    %47 = vector.load %arg13[%c40, %c0_61] : memref<72x324xbf16, #tpu.memory_space<vmem>>, vector<8x324xbf16>
    tpu.vector_store %arg13[%c40, %c0_61], %46 {strides = array<i32>} : memref<72x324xbf16, #tpu.memory_space<vmem>>, vector<8x324xbf16>,
    %c0_62 = arith.constant 0 : index
    %c36_63 = arith.constant 36 : index
    %48 = vector.load %arg12[%c0_62, %c36_63] : memref<8x362xbf16, #tpu.memory_space<vmem>>, vector<8x324xbf16>
    %c48 = arith.constant 48 : index
    %c0_64 = arith.constant 0 : index
    %49 = vector.load %arg13[%c48, %c0_64] : memref<72x324xbf16, #tpu.memory_space<vmem>>, vector<8x324xbf16>
    tpu.vector_store %arg13[%c48, %c0_64], %48 {strides = array<i32>} : memref<72x324xbf16, #tpu.memory_space<vmem>>, vector<8x324xbf16>,
    %c0_65 = arith.constant 0 : index
    %c37_66 = arith.constant 37 : index
    %50 = vector.load %arg12[%c0_65, %c37_66] : memref<8x362xbf16, #tpu.memory_space<vmem>>, vector<8x324xbf16>
    %c56 = arith.constant 56 : index
    %c0_67 = arith.constant 0 : index
    %51 = vector.load %arg13[%c56, %c0_67] : memref<72x324xbf16, #tpu.memory_space<vmem>>, vector<8x324xbf16>
    tpu.vector_store %arg13[%c56, %c0_67], %50 {strides = array<i32>} : memref<72x324xbf16, #tpu.memory_space<vmem>>, vector<8x324xbf16>,
    %c0_68 = arith.constant 0 : index
    %c38_69 = arith.constant 38 : index
    %52 = vector.load %arg12[%c0_68, %c38_69] : memref<8x362xbf16, #tpu.memory_space<vmem>>, vector<8x324xbf16>
    %c64 = arith.constant 64 : index
    %c0_70 = arith.constant 0 : index
    %53 = vector.load %arg13[%c64, %c0_70] : memref<72x324xbf16, #tpu.memory_space<vmem>>, vector<8x324xbf16>
    tpu.vector_store %arg13[%c64, %c0_70], %52 {strides = array<i32>} : memref<72x324xbf16, #tpu.memory_space<vmem>>, vector<8x324xbf16>,
    %c0_71 = arith.constant 0 : index
    %c0_72 = arith.constant 0 : index
    %54 = vector.load %arg5[%c0_71, %c0_72] : memref<8x72xbf16, #tpu.memory_space<vmem>>, vector<8x72xbf16>
    %c0_73 = arith.constant 0 : index
    %c0_74 = arith.constant 0 : index
    %55 = vector.load %arg13[%c0_73, %c0_74] : memref<72x324xbf16, #tpu.memory_space<vmem>>, vector<72x324xbf16>
    %cst_75 = arith.constant dense<0.000000e+00> : vector<8x324xf32>
    %56 = tpu.matmul %54, %55, %cst_75 {dimension_numbers = #tpu.dot_dimension_numbers<[1], [0], [0], [1], [0, 0, 1, 1], [], []>} : vector<8x72xbf16>, vector<72x324xbf16>, vector<8x324xf32> -> vector<8x324xf32>
    %c0_76 = arith.constant 0 : index
    %c0_77 = arith.constant 0 : index
    %57 = vector.load %arg6[%c0_76, %c0_77] : memref<8x1xf32, #tpu.memory_space<vmem>>, vector<8x1xf32>
    %58 = vector.broadcast %57 : vector<8x1xf32> to vector<8x324xf32>
    %59 = arith.addf %56, %58 : vector<8x324xf32>
    %cst_78 = arith.constant 0.000000e+00 : f32
    %60 = vector.broadcast %cst_78 : f32 to vector<8x324xf32>
    %61 = arith.maximumf %59, %60 : vector<8x324xf32>
    %c0_79 = arith.constant 0 : index
    %c0_80 = arith.constant 0 : index
    %62 = vector.load %arg2[%c0_79, %c0_80] : memref<1x324xf32, #tpu.memory_space<vmem>>, vector<1x324xf32>
    %63 = vector.broadcast %62 : vector<1x324xf32> to vector<8x324xf32>
    %64 = arith.mulf %61, %63 : vector<8x324xf32>
    %65 = arith.truncf %64 : vector<8x324xf32> to vector<8x324xbf16>
    %c0_81 = arith.constant 0 : index
    %c19_82 = arith.constant 19 : index
    %66 = vector.load %arg12[%c0_81, %c19_82] : memref<8x362xbf16, #tpu.memory_space<vmem>>, vector<8x324xbf16>
    tpu.vector_store %arg12[%c0_81, %c19_82], %65 {strides = array<i32>} : memref<8x362xbf16, #tpu.memory_space<vmem>>, vector<8x324xbf16>,
    %c0_83 = arith.constant 0 : index
    %c0_84 = arith.constant 0 : index
    %67 = vector.load %arg12[%c0_83, %c0_84] : memref<8x362xbf16, #tpu.memory_space<vmem>>, vector<8x324xbf16>
    %c0_85 = arith.constant 0 : index
    %c0_86 = arith.constant 0 : index
    %68 = vector.load %arg13[%c0_85, %c0_86] : memref<72x324xbf16, #tpu.memory_space<vmem>>, vector<8x324xbf16>
    tpu.vector_store %arg13[%c0_85, %c0_86], %67 {strides = array<i32>} : memref<72x324xbf16, #tpu.memory_space<vmem>>, vector<8x324xbf16>,
    %c0_87 = arith.constant 0 : index
    %c1_88 = arith.constant 1 : index
    %69 = vector.load %arg12[%c0_87, %c1_88] : memref<8x362xbf16, #tpu.memory_space<vmem>>, vector<8x324xbf16>
    %c8_89 = arith.constant 8 : index
    %c0_90 = arith.constant 0 : index
    %70 = vector.load %arg13[%c8_89, %c0_90] : memref<72x324xbf16, #tpu.memory_space<vmem>>, vector<8x324xbf16>
    tpu.vector_store %arg13[%c8_89, %c0_90], %69 {strides = array<i32>} : memref<72x324xbf16, #tpu.memory_space<vmem>>, vector<8x324xbf16>,
    %c0_91 = arith.constant 0 : index
    %c2_92 = arith.constant 2 : index
    %71 = vector.load %arg12[%c0_91, %c2_92] : memref<8x362xbf16, #tpu.memory_space<vmem>>, vector<8x324xbf16>
    %c16_93 = arith.constant 16 : index
    %c0_94 = arith.constant 0 : index
    %72 = vector.load %arg13[%c16_93, %c0_94] : memref<72x324xbf16, #tpu.memory_space<vmem>>, vector<8x324xbf16>
    tpu.vector_store %arg13[%c16_93, %c0_94], %71 {strides = array<i32>} : memref<72x324xbf16, #tpu.memory_space<vmem>>, vector<8x324xbf16>,
    %c0_95 = arith.constant 0 : index
    %c18_96 = arith.constant 18 : index
    %73 = vector.load %arg12[%c0_95, %c18_96] : memref<8x362xbf16, #tpu.memory_space<vmem>>, vector<8x324xbf16>
    %c24_97 = arith.constant 24 : index
    %c0_98 = arith.constant 0 : index
    %74 = vector.load %arg13[%c24_97, %c0_98] : memref<72x324xbf16, #tpu.memory_space<vmem>>, vector<8x324xbf16>
    tpu.vector_store %arg13[%c24_97, %c0_98], %73 {strides = array<i32>} : memref<72x324xbf16, #tpu.memory_space<vmem>>, vector<8x324xbf16>,
    %c0_99 = arith.constant 0 : index
    %c19_100 = arith.constant 19 : index
    %75 = vector.load %arg12[%c0_99, %c19_100] : memref<8x362xbf16, #tpu.memory_space<vmem>>, vector<8x324xbf16>
    %c32_101 = arith.constant 32 : index
    %c0_102 = arith.constant 0 : index
    %76 = vector.load %arg13[%c32_101, %c0_102] : memref<72x324xbf16, #tpu.memory_space<vmem>>, vector<8x324xbf16>
    tpu.vector_store %arg13[%c32_101, %c0_102], %75 {strides = array<i32>} : memref<72x324xbf16, #tpu.memory_space<vmem>>, vector<8x324xbf16>,
    %c0_103 = arith.constant 0 : index
    %c20_104 = arith.constant 20 : index
    %77 = vector.load %arg12[%c0_103, %c20_104] : memref<8x362xbf16, #tpu.memory_space<vmem>>, vector<8x324xbf16>
    %c40_105 = arith.constant 40 : index
    %c0_106 = arith.constant 0 : index
    %78 = vector.load %arg13[%c40_105, %c0_106] : memref<72x324xbf16, #tpu.memory_space<vmem>>, vector<8x324xbf16>
    tpu.vector_store %arg13[%c40_105, %c0_106], %77 {strides = array<i32>} : memref<72x324xbf16, #tpu.memory_space<vmem>>, vector<8x324xbf16>,
    %c0_107 = arith.constant 0 : index
    %c36_108 = arith.constant 36 : index
    %79 = vector.load %arg12[%c0_107, %c36_108] : memref<8x362xbf16, #tpu.memory_space<vmem>>, vector<8x324xbf16>
    %c48_109 = arith.constant 48 : index
    %c0_110 = arith.constant 0 : index
    %80 = vector.load %arg13[%c48_109, %c0_110] : memref<72x324xbf16, #tpu.memory_space<vmem>>, vector<8x324xbf16>
    tpu.vector_store %arg13[%c48_109, %c0_110], %79 {strides = array<i32>} : memref<72x324xbf16, #tpu.memory_space<vmem>>, vector<8x324xbf16>,
    %c0_111 = arith.constant 0 : index
    %c37_112 = arith.constant 37 : index
    %81 = vector.load %arg12[%c0_111, %c37_112] : memref<8x362xbf16, #tpu.memory_space<vmem>>, vector<8x324xbf16>
    %c56_113 = arith.constant 56 : index
    %c0_114 = arith.constant 0 : index
    %82 = vector.load %arg13[%c56_113, %c0_114] : memref<72x324xbf16, #tpu.memory_space<vmem>>, vector<8x324xbf16>
    tpu.vector_store %arg13[%c56_113, %c0_114], %81 {strides = array<i32>} : memref<72x324xbf16, #tpu.memory_space<vmem>>, vector<8x324xbf16>,
    %c0_115 = arith.constant 0 : index
    %c38_116 = arith.constant 38 : index
    %83 = vector.load %arg12[%c0_115, %c38_116] : memref<8x362xbf16, #tpu.memory_space<vmem>>, vector<8x324xbf16>
    %c64_117 = arith.constant 64 : index
    %c0_118 = arith.constant 0 : index
    %84 = vector.load %arg13[%c64_117, %c0_118] : memref<72x324xbf16, #tpu.memory_space<vmem>>, vector<8x324xbf16>
    tpu.vector_store %arg13[%c64_117, %c0_118], %83 {strides = array<i32>} : memref<72x324xbf16, #tpu.memory_space<vmem>>, vector<8x324xbf16>,
    %c0_119 = arith.constant 0 : index
    %c0_120 = arith.constant 0 : index
    %85 = vector.load %arg7[%c0_119, %c0_120] : memref<4x72xbf16, #tpu.memory_space<vmem>>, vector<4x72xbf16>
    %c0_121 = arith.constant 0 : index
    %c0_122 = arith.constant 0 : index
    %86 = vector.load %arg13[%c0_121, %c0_122] : memref<72x324xbf16, #tpu.memory_space<vmem>>, vector<72x324xbf16>
    %cst_123 = arith.constant dense<0.000000e+00> : vector<4x324xf32>
    %87 = tpu.matmul %85, %86, %cst_123 {dimension_numbers = #tpu.dot_dimension_numbers<[1], [0], [0], [1], [0, 0, 1, 1], [], []>} : vector<4x72xbf16>, vector<72x324xbf16>, vector<4x324xf32> -> vector<4x324xf32>
    %c0_124 = arith.constant 0 : index
    %c0_125 = arith.constant 0 : index
    %88 = vector.load %arg8[%c0_124, %c0_125] : memref<4x1xf32, #tpu.memory_space<vmem>>, vector<4x1xf32>
    %89 = vector.broadcast %88 : vector<4x1xf32> to vector<4x324xf32>
    %90 = arith.addf %87, %89 : vector<4x324xf32>
    %cst_126 = arith.constant 0.000000e+00 : f32
    %91 = vector.broadcast %cst_126 : f32 to vector<4x324xf32>
    %92 = arith.maximumf %90, %91 : vector<4x324xf32>
    %c0_127 = arith.constant 0 : index
    %c0_128 = arith.constant 0 : index
    %93 = vector.load %arg2[%c0_127, %c0_128] : memref<1x324xf32, #tpu.memory_space<vmem>>, vector<1x324xf32>
    %94 = vector.broadcast %93 : vector<1x324xf32> to vector<4x324xf32>
    %95 = arith.mulf %92, %94 : vector<4x324xf32>
    %96 = arith.truncf %95 : vector<4x324xf32> to vector<4x324xbf16>
    %c0_129 = arith.constant 0 : index
    %c19_130 = arith.constant 19 : index
    %97 = vector.load %arg12[%c0_129, %c19_130] : memref<8x362xbf16, #tpu.memory_space<vmem>>, vector<4x324xbf16>
    tpu.vector_store %arg12[%c0_129, %c19_130], %96 {strides = array<i32>} : memref<8x362xbf16, #tpu.memory_space<vmem>>, vector<4x324xbf16>,
    %c0_131 = arith.constant 0 : index
    %c0_132 = arith.constant 0 : index
    %98 = vector.load %arg12[%c0_131, %c0_132] : memref<8x362xbf16, #tpu.memory_space<vmem>>, vector<4x324xbf16>
    %c0_133 = arith.constant 0 : index
    %c0_134 = arith.constant 0 : index
    %99 = vector.load %arg13[%c0_133, %c0_134] : memref<72x324xbf16, #tpu.memory_space<vmem>>, vector<4x324xbf16>
    tpu.vector_store %arg13[%c0_133, %c0_134], %98 {strides = array<i32>} : memref<72x324xbf16, #tpu.memory_space<vmem>>, vector<4x324xbf16>,
    %c0_135 = arith.constant 0 : index
    %c1_136 = arith.constant 1 : index
    %100 = vector.load %arg12[%c0_135, %c1_136] : memref<8x362xbf16, #tpu.memory_space<vmem>>, vector<4x324xbf16>
    %c4_137 = arith.constant 4 : index
    %c0_138 = arith.constant 0 : index
    %101 = vector.load %arg13[%c4_137, %c0_138] : memref<72x324xbf16, #tpu.memory_space<vmem>>, vector<4x324xbf16>
    tpu.vector_store %arg13[%c4_137, %c0_138], %100 {strides = array<i32>} : memref<72x324xbf16, #tpu.memory_space<vmem>>, vector<4x324xbf16>,
    %c0_139 = arith.constant 0 : index
    %c2_140 = arith.constant 2 : index
    %102 = vector.load %arg12[%c0_139, %c2_140] : memref<8x362xbf16, #tpu.memory_space<vmem>>, vector<4x324xbf16>
    %c8_141 = arith.constant 8 : index
    %c0_142 = arith.constant 0 : index
    %103 = vector.load %arg13[%c8_141, %c0_142] : memref<72x324xbf16, #tpu.memory_space<vmem>>, vector<4x324xbf16>
    tpu.vector_store %arg13[%c8_141, %c0_142], %102 {strides = array<i32>} : memref<72x324xbf16, #tpu.memory_space<vmem>>, vector<4x324xbf16>,
    %c0_143 = arith.constant 0 : index
    %c18_144 = arith.constant 18 : index
    %104 = vector.load %arg12[%c0_143, %c18_144] : memref<8x362xbf16, #tpu.memory_space<vmem>>, vector<4x324xbf16>
    %c12_145 = arith.constant 12 : index
    %c0_146 = arith.constant 0 : index
    %105 = vector.load %arg13[%c12_145, %c0_146] : memref<72x324xbf16, #tpu.memory_space<vmem>>, vector<4x324xbf16>
    tpu.vector_store %arg13[%c12_145, %c0_146], %104 {strides = array<i32>} : memref<72x324xbf16, #tpu.memory_space<vmem>>, vector<4x324xbf16>,
    %c0_147 = arith.constant 0 : index
    %c19_148 = arith.constant 19 : index
    %106 = vector.load %arg12[%c0_147, %c19_148] : memref<8x362xbf16, #tpu.memory_space<vmem>>, vector<4x324xbf16>
    %c16_149 = arith.constant 16 : index
    %c0_150 = arith.constant 0 : index
    %107 = vector.load %arg13[%c16_149, %c0_150] : memref<72x324xbf16, #tpu.memory_space<vmem>>, vector<4x324xbf16>
    tpu.vector_store %arg13[%c16_149, %c0_150], %106 {strides = array<i32>} : memref<72x324xbf16, #tpu.memory_space<vmem>>, vector<4x324xbf16>,
    %c0_151 = arith.constant 0 : index
    %c20_152 = arith.constant 20 : index
    %108 = vector.load %arg12[%c0_151, %c20_152] : memref<8x362xbf16, #tpu.memory_space<vmem>>, vector<4x324xbf16>
    %c20_153 = arith.constant 20 : index
    %c0_154 = arith.constant 0 : index
    %109 = vector.load %arg13[%c20_153, %c0_154] : memref<72x324xbf16, #tpu.memory_space<vmem>>, vector<4x324xbf16>
    tpu.vector_store %arg13[%c20_153, %c0_154], %108 {strides = array<i32>} : memref<72x324xbf16, #tpu.memory_space<vmem>>, vector<4x324xbf16>,
    %c0_155 = arith.constant 0 : index
    %c36_156 = arith.constant 36 : index
    %110 = vector.load %arg12[%c0_155, %c36_156] : memref<8x362xbf16, #tpu.memory_space<vmem>>, vector<4x324xbf16>
    %c24_157 = arith.constant 24 : index
    %c0_158 = arith.constant 0 : index
    %111 = vector.load %arg13[%c24_157, %c0_158] : memref<72x324xbf16, #tpu.memory_space<vmem>>, vector<4x324xbf16>
    tpu.vector_store %arg13[%c24_157, %c0_158], %110 {strides = array<i32>} : memref<72x324xbf16, #tpu.memory_space<vmem>>, vector<4x324xbf16>,
    %c0_159 = arith.constant 0 : index
    %c37_160 = arith.constant 37 : index
    %112 = vector.load %arg12[%c0_159, %c37_160] : memref<8x362xbf16, #tpu.memory_space<vmem>>, vector<4x324xbf16>
    %c28_161 = arith.constant 28 : index
    %c0_162 = arith.constant 0 : index
    %113 = vector.load %arg13[%c28_161, %c0_162] : memref<72x324xbf16, #tpu.memory_space<vmem>>, vector<4x324xbf16>
    tpu.vector_store %arg13[%c28_161, %c0_162], %112 {strides = array<i32>} : memref<72x324xbf16, #tpu.memory_space<vmem>>, vector<4x324xbf16>,
    %c0_163 = arith.constant 0 : index
    %c38_164 = arith.constant 38 : index
    %114 = vector.load %arg12[%c0_163, %c38_164] : memref<8x362xbf16, #tpu.memory_space<vmem>>, vector<4x324xbf16>
    %c32_165 = arith.constant 32 : index
    %c0_166 = arith.constant 0 : index
    %115 = vector.load %arg13[%c32_165, %c0_166] : memref<72x324xbf16, #tpu.memory_space<vmem>>, vector<4x324xbf16>
    tpu.vector_store %arg13[%c32_165, %c0_166], %114 {strides = array<i32>} : memref<72x324xbf16, #tpu.memory_space<vmem>>, vector<4x324xbf16>,
    %c0_167 = arith.constant 0 : index
    %c0_168 = arith.constant 0 : index
    %116 = vector.load %arg9[%c0_167, %c0_168] : memref<2x36xbf16, #tpu.memory_space<vmem>>, vector<2x36xbf16>
    %c0_169 = arith.constant 0 : index
    %c0_170 = arith.constant 0 : index
    %117 = vector.load %arg13[%c0_169, %c0_170] : memref<72x324xbf16, #tpu.memory_space<vmem>>, vector<36x324xbf16>
    %cst_171 = arith.constant dense<0.000000e+00> : vector<2x324xf32>
    %118 = tpu.matmul %116, %117, %cst_171 {dimension_numbers = #tpu.dot_dimension_numbers<[1], [0], [0], [1], [0, 0, 1, 1], [], []>} : vector<2x36xbf16>, vector<36x324xbf16>, vector<2x324xf32> -> vector<2x324xf32>
    %c0_172 = arith.constant 0 : index
    %c0_173 = arith.constant 0 : index
    %119 = vector.load %arg10[%c0_172, %c0_173] : memref<2x1xf32, #tpu.memory_space<vmem>>, vector<2x1xf32>
    %120 = vector.broadcast %119 : vector<2x1xf32> to vector<2x324xf32>
    %121 = arith.addf %118, %120 : vector<2x324xf32>
    %c0_174 = arith.constant 0 : index
    %c0_175 = arith.constant 0 : index
    %122 = vector.load %arg2[%c0_174, %c0_175] : memref<1x324xf32, #tpu.memory_space<vmem>>, vector<1x324xf32>
    %123 = vector.broadcast %122 : vector<1x324xf32> to vector<2x324xf32>
    %124 = arith.mulf %121, %123 : vector<2x324xf32>
    %c0_176 = arith.constant 0 : index
    %c0_177 = arith.constant 0 : index
    %c0_178 = arith.constant 0 : index
    %125 = vector.load %arg11[%c0_176, %c0_177, %c0_178] : memref<1x2x324xf32, #tpu.memory_space<vmem>>, vector<1x2x324xf32>
    %126 = vector.shape_cast %125 : vector<1x2x324xf32> to vector<2x324xf32>
    %127 = vector.shape_cast %124 : vector<2x324xf32> to vector<1x2x324xf32>
    tpu.vector_store %arg11[%c0_176, %c0_177, %c0_178], %127 {strides = array<i32>} : memref<1x2x324xf32, #tpu.memory_space<vmem>>, vector<1x2x324xf32>,
    return
  }
  func.func @transform_0(%arg0: i32) -> (i32, i32, i32) {
    %c0_i32 = arith.constant 0 : i32
    %c0_i32_0 = arith.constant 0 : i32
    %c0_i32_1 = arith.constant 0 : i32
    return %arg0, %c0_i32, %c0_i32_0 : i32, i32, i32
  }
  func.func @transform_1(%arg0: i32) -> (i32, i32) {
    %c0_i32 = arith.constant 0 : i32
    %c0_i32_0 = arith.constant 0 : i32
    %c0_i32_1 = arith.constant 0 : i32
    return %c0_i32, %c0_i32_0 : i32, i32
  }
  func.func @transform_2(%arg0: i32) -> (i32, i32) {
    %c0_i32 = arith.constant 0 : i32
    %c0_i32_0 = arith.constant 0 : i32
    %c0_i32_1 = arith.constant 0 : i32
    return %c0_i32, %c0_i32_0 : i32, i32
  }
  func.func @transform_3(%arg0: i32) -> (i32, i32) {
    %c0_i32 = arith.constant 0 : i32
    %c0_i32_0 = arith.constant 0 : i32
    %c0_i32_1 = arith.constant 0 : i32
    return %c0_i32, %c0_i32_0 : i32, i32
  }
  func.func @transform_4(%arg0: i32) -> (i32, i32) {
    %c0_i32 = arith.constant 0 : i32
    %c0_i32_0 = arith.constant 0 : i32
    %c0_i32_1 = arith.constant 0 : i32
    return %c0_i32, %c0_i32_0 : i32, i32
  }
  func.func @transform_5(%arg0: i32) -> (i32, i32) {
    %c0_i32 = arith.constant 0 : i32
    %c0_i32_0 = arith.constant 0 : i32
    %c0_i32_1 = arith.constant 0 : i32
    return %c0_i32, %c0_i32_0 : i32, i32
  }
  func.func @transform_6(%arg0: i32) -> (i32, i32) {
    %c0_i32 = arith.constant 0 : i32
    %c0_i32_0 = arith.constant 0 : i32
    %c0_i32_1 = arith.constant 0 : i32
    return %c0_i32, %c0_i32_0 : i32, i32
  }
  func.func @transform_7(%arg0: i32) -> (i32, i32) {
    %c0_i32 = arith.constant 0 : i32
    %c0_i32_0 = arith.constant 0 : i32
    %c0_i32_1 = arith.constant 0 : i32
    return %c0_i32, %c0_i32_0 : i32, i32
  }
  func.func @transform_8(%arg0: i32) -> (i32, i32) {
    %c0_i32 = arith.constant 0 : i32
    %c0_i32_0 = arith.constant 0 : i32
    %c0_i32_1 = arith.constant 0 : i32
    return %c0_i32, %c0_i32_0 : i32, i32
  }
  func.func @transform_9(%arg0: i32) -> (i32, i32) {
    %c0_i32 = arith.constant 0 : i32
    %c0_i32_0 = arith.constant 0 : i32
    %c0_i32_1 = arith.constant 0 : i32
    return %c0_i32, %c0_i32_0 : i32, i32
  }
  func.func @transform_10(%arg0: i32) -> (i32, i32, i32) {
    %c0_i32 = arith.constant 0 : i32
    %c0_i32_0 = arith.constant 0 : i32
    %c0_i32_1 = arith.constant 0 : i32
    return %arg0, %c0_i32, %c0_i32_0 : i32, i32, i32
  }
}

</mosaic_0001>

<bundles_post_ra>
// kernel: tpu_custom_call.1
= control target key start
LH: loop header
LB: loop body
LE: loop exit
PB: predicated region body
PF: predicated region fallthrough
CT: control target
= control target key end

     0   :  { %15 = vsyncpa [#allocation5], 0  ;;  %s2666_s0 = inlined_call_operand.vmem [shape: bf16[2,4,362], index: 0, kind: input, shape index: {}]   ;;  %s2667_s1 = inlined_call_operand.vmem [shape: f32[1,324], index: 1, kind: input, shape index: {}]   ;;  %s2668_s2 = inlined_call_operand.vmem [shape: bf16[8,36], index: 2, kind: input, shape index: {}]   ;;  %s2669_s3 = inlined_call_operand.vmem [shape: f32[8,1], index: 3, kind: input, shape index: {}]   ;;  %s2670_s4 = inlined_call_operand.vmem [shape: bf16[8,72], index: 4, kind: input, shape index: {}]   ;;  %s2671_s5 = inlined_call_operand.vmem [shape: f32[8,1], index: 5, kind: input, shape index: {}]   ;;  %s2672_s6 = inlined_call_operand.vmem [shape: bf16[4,72], index: 6, kind: input, shape index: {}]   ;;  %s2673_s7 = inlined_call_operand.vmem [shape: f32[4,1], index: 7, kind: input, shape index: {}]   ;;  %s2674_s8 = inlined_call_operand.vmem [shape: bf16[2,36], index: 8, kind: input, shape index: {}]   ;;  %s2675_s9 = inlined_call_operand.vmem [shape: f32[2,1], index: 9, kind: input, shape index: {}]   ;;  %s2676_s10 = inlined_call_operand.hbm [shape: f32[2,2,324], index: 10, kind: output, shape index: {}]  }
   0x1   :  { %17 = vsyncpa [#allocation5 + $0x1], 0  ;;  %s2258_s13 = smov 0   ;;  %s2260_s14 = smov 0  }
   0x2   :  { %s2262_s15 = smov 0   ;;  %s2264_s16 = smov 0  }
   0x3 LB: > { %s2279_s17 = sadd.s32 4294967295, %s2187_s16   ;;  %s1887_s18 = sadd.s32 4294967294, %s2187_s16   ;;  %s2187_s16 = sphi %s2264_s16, %s2709_s16   ;;  %s2183_s15 = sphi %s2262_s15, %s2708_s15   ;;  %s2179_s14 = sphi %s2260_s14, %s2707_s14   ;;  %s2175_s13 = sphi %s2258_s13, %s2706_s13  }
   0x4   : > { %s2283_s19 = sadd.s32 1, %s2187_s16   ;;  %s245_s20 = sadd.s32 1, %s2183_s15 }
   0x5   : > { %s242_s21 = ssub.s32 %s2187_s16, %s2283_s19  ;;  %p255_p0 = scmp.ne.s32.totalorder %s2183_s15, %s2179_s14 }
   0x6   : > { %p243_p1 = scmp.eq.s32.totalorder %s242_s21, 0  ;;  %p256_p2 = scmp.eq.s32.totalorder %s2279_s17, 1 }
   0x7   : > { %p261_p3 = scmp.ne.s32.totalorder %s2179_s14, %s2175_s13  ;;  %p262_p4 = scmp.eq.s32.totalorder %s1887_s18, 1 }
   0x8   : > { %s2294_s22 = scalar_select %p243_p1, %s2183_s15, %s245_s20  }
   0x9   : > { %p2296_p5 = por %p256_p2, %p255_p0  ;;  %p2300_p6 = por %p262_p4, %p261_p3 }
   0xa   : > { %p1890_p7 = scmp.ge.s32.totalorder %s2187_s16, 1  ;;  %p315_p8 = scmp.lt.s32.totalorder %s2187_s16, 3 }
   0xc   : > { %p316_p9 = pnand %p1890_p7, %p315_p8 }
   0xd   : > { %p353_p10 = scmp.lt.s32.totalorder (!%p316_p9), %s2279_s17, 1  ;;  %v375_v0 = vlaneseq (!%p316_p9)  ;;  %vm360_vm0 = vcmask (!%p316_p9), 863232   ;;  %v2189_v1 = vmov (!%p316_p9), 0   ;;  %v2190_v2 = vmov (!%p316_p9), 1983009808   ;;  %s2191_s30 = smov (!%p316_p9), 109  }
   0xe   : > { %319 = sbr.rel (%p316_p9) target bundleno = 1946 (0x79a), region = 60  ;;  %359 = vst [vmem:[#allocation2] sm:$0xff] (!%p316_p9), %v2189_v1  ;;  %v373_v3 = vunpack.c.l.s4 (!%p316_p9), %v2190_v2  ;;  %361 = vst.msk [vmem:[#allocation2 + $0x8] sm:$0xf] (!%p316_p9), %vm360_vm0, %v2189_v1  ;;  %638 = vmatprep.mubr.bf16.mxu0 (!%p316_p9), %v2189_v1  ;;  %2091 = vset.pattern.permute.xlu0 (!%p316_p9), %v2189_v1  ;;  %vm382_vm1 = vcmask (!%p316_p9), 861184   ;;  %s2192_s11 = smov (!%p316_p9), 126  }
   0xf   : > { %v2312_v4 = vshrl.u32 (!%p316_p9), %v375_v0, 7  ;;  %2092 = vset.pattern.permute.xlu1 (!%p316_p9), %v2189_v1  ;;  %s2193_s12 = smov (!%p316_p9), 92   ;;  %vm2680_vm2 = vcmask (!%p316_p9), 549888   ;;  %s2194_s18 = smov (!%p316_p9), 127   ;;  %v2196_v28 = vmov (!%p316_p9), 0.0   ;;  %v546_v37 = vld [vmem:[%s2669_s3] sm:$0xff] (!%p316_p9) }
  0x10   : > { %v374_v5 = vunpack.c.0.s8 (!%p316_p9), %v373_v3  ;;  %s2195_s20 = smov (!%p316_p9), 110   ;;  %1988 = vmatprep.subr.bf16.mxu1 (!%p316_p9), %v2196_v28  ;;  %s2197_s21 = smov (!%p316_p9), 108   ;;  %vm2200_vm3 = vmmov (!%p316_p9), 0   ;;  %vm401_vm4 = vcmask (!%p316_p9), 1043456   ;;  %vm421_vm5 = vcmask (!%p316_p9), 1031168  }
  0x11   : > { %1994 = vmatprep.mubr.msk.bf16.mxu1 (!%p316_p9), %vm2200_vm3, %v2196_v28  ;;  %vm457_vm6 = vcmask (!%p316_p9), 891904   ;;  %vm493_vm7 = vcmask (!%p316_p9), 752640   ;;  %vm2679_vm8 = vcmask (!%p316_p9), 551938   ;;  %vm440_vm9 = vcmask (!%p316_p9), 900096   ;;  %s2201_s27 = smov (!%p316_p9), 19  }
  0x12   : > { %v2319_v6 = vsub.s32 (!%p316_p9), %v374_v5, %v2312_v4  ;;  %vm476_vm10 = vcmask (!%p316_p9), 883712   ;;  %vm403_vm11 = vcmask (!%p316_p9), 1039360   ;;  %vm512_vm12 = vcmask (!%p316_p9), 744448  }
  0x13   : > { %vm529_vm13 = vcmask (!%p316_p9), 736256   ;;  %vm2678_vm14 = vcmask (!%p316_p9), 1041408   ;;  %vm2677_vm15 = vcmask (!%p316_p9), 293888   ;;  %vm731_vm0 = vcmask (!%p316_p9), 1043608  }
  0x15   : > { %s354_s25 = scalar_select %p353_p10, %s2279_s17, 1 }
  0x17   : > { %s2037_s26 = smul.u32 6, %s354_s25  ;;  %s2683_s25 = smov 91  }
  0x19   : > { %s357_s29 = scalar_lea.vmem %s2666_s0, %s2037_s26  ;;  %s2681_s26 = smov 90  }
  0x1a   : > { %v362_v7 = vld [vmem:[%s357_s29] sm:$0x3f]  ;;  %s2038_s29 = smul.u32 96, %s2279_s17 }
  0x1b   : > { %1892 = vst.sshfl [vmem:[#allocation2] sm:$0xf pattern:$0x76325410] %v362_v7  ;;  %v364_v8 = vcombine.high %v362_v7, %v362_v7 }
  0x1d   : > { %v378_v9 = vrot.slane %v364_v8, %v2319_v6 }
  0x1f   : > { %383 = vst.msk [vmem:[#allocation2 + $0x8] sm:$0x3] %vm382_vm1, %v378_v9  ;;  %vm732_vm1 = vcmask 1047556  }
  0x22   : > { %v446_v10 = vld [vmem:[#allocation2] sm:$0x33] }
  0x23   : > { %v410_v11 = vld [vmem:[#allocation2] sm:$0x33]  ;;  %450 = vrot.lane.b32.xlu0 %v446_v10, %s2191_s30 }
  0x24   : > { %414 = vrot.lane.b32.xlu1 %v410_v11, %s2192_s11  ;;  %v482_v12 = vld [vmem:[#allocation2] sm:$0x33] }
  0x25   : > { %v389_v13 = vld [vmem:[#allocation2] sm:$0x33] }
  0x26   : > { %v411_v14 = vld [vmem:[#allocation2 + $0x8] sm:$0x3]  ;;  %v393_v15 = vrot.slane %v389_v13, 6  ;;  %v427_v17 = vld [vmem:[#allocation2] sm:$0x33] }
  0x27   : > { %486 = vrot.lane.b32.xlu0 %v482_v12, %s2193_s12  ;;  %v447_v16 = vld [vmem:[#allocation2 + $0x8] sm:$0x3]  ;;  %v431_v19 = vrot.slane %v427_v17, 6  ;;  %v463_v21 = vld [vmem:[#allocation2] sm:$0x33] }
  0x28   : > { %416 = vrot.lane.b32.xlu1 %v411_v14, %s2192_s11  ;;  %v385_v18 = vld [vmem:[#allocation2 + $0x8] sm:$0x3]  ;;  %v384_v23 = vld [vmem:[#allocation2] sm:$0x33]  ;;  %v467_v24 = vrot.slane %v463_v21, 6 }
  0x29   : > { %388 = vst.msk [vmem:[#allocation3 + $0x8] sm:$0x3] %vm2680_vm2, %v385_v18  ;;  %v483_v20 = vld [vmem:[#allocation2 + $0x8] sm:$0x3]  ;;  %386 = vst [vmem:[#allocation3] sm:$0x33] %v384_v23 }
  0x2a   : > { %v428_v22 = vld [vmem:[#allocation2 + $0x8] sm:$0x3]  ;;  %v499_v32 = vld [vmem:[#allocation2] sm:$0x33] }
  0x2b   : > { %395 = vrot.lane.b32.xlu0 %v393_v15, %s2194_s18  ;;  %v432_v25 = vrot.slane %v428_v22, 6  ;;  %v464_v26 = vld [vmem:[#allocation2 + $0x8] sm:$0x3]  ;;  %v503_v34 = vrot.slane %v499_v32, 6  ;;  %v518_v36 = vld [vmem:[#allocation2] sm:$0x33] }
  0x2c   : > { %452 = vrot.lane.b32.xlu1 %v447_v16, %s2191_s30  ;;  %v390_v27 = vld [vmem:[#allocation2 + $0x8] sm:$0x3]  ;;  %v468_v29 = vrot.slane %v464_v26, 6 }
  0x2d   : > { %v394_v30 = vrot.slane %v390_v27, 6  ;;  %v500_v31 = vld [vmem:[#allocation2 + $0x8] sm:$0x3] }
  0x2e   : > { %v504_v33 = vrot.slane %v500_v31, 6  ;;  %v519_v35 = vld [vmem:[#allocation2 + $0x8] sm:$0x3] }
  0x2f   : > { %433 = vrot.lane.b32.xlu0 %v431_v19, %s2195_s20 }
  0x30   : > { %488 = vrot.lane.b32.xlu1 %v483_v20, %s2193_s12 }
  0x33   : > { %469 = vrot.lane.b32.xlu0 %v467_v24, %s2197_s21 }
  0x34   : > { %435 = vrot.lane.b32.xlu1 %v432_v25, %s2195_s20 }
  0x37   : > { %397 = vrot.lane.b32.xlu0 %v394_v30, %s2194_s18 }
  0x38   : > { %471 = vrot.lane.b32.xlu1 %v468_v29, %s2197_s21 }
  0x3b   : > { %505 = vrot.lane.b32.xlu0 %v503_v34, %s2683_s25 }
  0x3c   : > { %507 = vrot.lane.b32.xlu1 %v504_v33, %s2683_s25 }
  0x3f   : > { %522 = vrot.lane.b32.xlu0 %v518_v36, %s2681_s26 }
  0x40   : > { %524 = vrot.lane.b32.xlu1 %v519_v35, %s2681_s26  ;;  %v535_v35 = vld [vmem:[%s2668_s2] sm:$0xf] }
  0x43   : > { %549 = vperm.xlu0 %2091, %v546_v37  }
  0x95   : > { %v451_v38 = vpop.permute.xlu0 %450 }
  0x96   : > { %v415_v39 = vpop.permute.xlu1 %414  ;;  %v454_v48 = vrot.slane %v451_v38, 4 }
  0x97   : > { %v418_v42 = vrot.slane %v415_v39, 4 }
  0x99   : > { %v487_v40 = vpop.permute.xlu0 %486 }
  0x9a   : > { %v417_v41 = vpop.permute.xlu1 %416  ;;  %v490_v54 = vrot.slane %v487_v40, 4 }
  0x9b   : > { %v419_v43 = vrot.slane %v417_v41, 4  ;;  %426 = vst.msk [vmem:[#allocation3 + $0x14] sm:$0x3] %vm2680_vm2, %v417_v41 }
  0x9d   : > { %v420_v44 = vsel %vm401_vm4, %v418_v42, %v419_v43  ;;  %v396_v46 = vpop.permute.xlu0 %395  ;;  %v2384_v42 = vsub.s32 0, %v2312_v4  ;;  %v690_v43 = vld [vmem:[%s2667_s1] sm:$0x7] }
  0x9e   : > { %v422_v45 = vsel %vm421_vm5, %v415_v39, %v420_v44  ;;  %v453_v47 = vpop.permute.xlu1 %452  ;;  %v399_v3 = vrot.slane %v396_v46, 4  ;;  %v2390_v44 = vsub.s32 1, %v2312_v4 }
  0x9f   : > { %425 = vst [vmem:[#allocation3 + $0xc] sm:$0x33] %v422_v45  ;;  %v455_v49 = vrot.slane %v453_v47, 4  ;;  %462 = vst.msk [vmem:[#allocation3 + $0x20] sm:$0x3] %vm2680_vm2, %v453_v47 }
  0xa1   : > { %v456_v50 = vsel %vm401_vm4, %v454_v48, %v455_v49  ;;  %v434_v52 = vpop.permute.xlu0 %433  ;;  %v2393_v49 = vsub.s32 2, %v2312_v4 }
  0xa2   : > { %v458_v51 = vsel %vm457_vm6, %v451_v38, %v456_v50  ;;  %v489_v53 = vpop.permute.xlu1 %488  ;;  %v437_v60 = vrot.slane %v434_v52, 4 }
  0xa3   : > { %461 = vst [vmem:[#allocation3 + $0x18] sm:$0x33] %v458_v51  ;;  %v491_v55 = vrot.slane %v489_v53, 4  ;;  %498 = vst.msk [vmem:[#allocation3 + $0x2c] sm:$0x3] %vm2680_vm2, %v489_v53 }
  0xa5   : > { %v492_v56 = vsel %vm401_vm4, %v490_v54, %v491_v55  ;;  %v470_v58 = vpop.permute.xlu0 %469  ;;  %v699_v54 = vrot.slane %v690_v43, %v2390_v44 }
  0xa6   : > { %v494_v57 = vsel %vm493_vm7, %v487_v40, %v492_v56  ;;  %v436_v59 = vpop.permute.xlu1 %435  ;;  %v473_v5 = vrot.slane %v470_v58, 4 }
  0xa7   : > { %497 = vst [vmem:[#allocation3 + $0x24] sm:$0x33] %v494_v57  ;;  %v438_v61 = vrot.slane %v436_v59, 4  ;;  %445 = vst.msk [vmem:[#allocation3 + $0x14] sm:$0xc] %vm2679_vm8, %v436_v59 }
  0xa9   : > { %v439_v62 = vsel %vm401_vm4, %v437_v60, %v438_v61  ;;  %v398_v2 = vpop.permute.xlu0 %397  ;;  %v703_v60 = vrot.slane %v690_v43, %v2393_v49 }
  0xaa   : > { %v441_v63 = vsel %vm440_vm9, %v434_v52, %v439_v62  ;;  %v472_v0 = vpop.permute.xlu1 %471  ;;  %v400_v8 = vrot.slane %v398_v2, 4  ;;  %409 = vst.msk [vmem:[#allocation3 + $0x8] sm:$0xc] %vm2679_vm8, %v398_v2  ;;  %v695_v52 = vrot.slane %v690_v43, %v2384_v42 }
  0xab   : > { %444 = vst [vmem:[#allocation3 + $0xc] sm:$0xcc] %v441_v63  ;;  %v474_v7 = vrot.slane %v472_v0, 4  ;;  %481 = vst.msk [vmem:[#allocation3 + $0x20] sm:$0xc] %vm2679_vm8, %v472_v0 }
  0xac   : > { %v402_v10 = vsel %vm401_vm4, %v399_v3, %v400_v8 }
  0xad   : > { %v475_v9 = vsel %vm401_vm4, %v473_v5, %v474_v7  ;;  %v404_v12 = vsel %vm403_vm11, %v396_v46, %v402_v10  ;;  %v506_v14 = vpop.permute.xlu0 %505 }
  0xae   : > { %v477_v11 = vsel %vm476_vm10, %v470_v58, %v475_v9  ;;  %v508_v13 = vpop.permute.xlu1 %507  ;;  %407 = vst [vmem:[#allocation3] sm:$0xcc] %v404_v12  ;;  %v509_v16 = vrot.slane %v506_v14, 4 }
  0xaf   : > { %480 = vst [vmem:[#allocation3 + $0x18] sm:$0xcc] %v477_v11  ;;  %v510_v15 = vrot.slane %v508_v13, 4  ;;  %517 = vst.msk [vmem:[#allocation3 + $0x2c] sm:$0xc] %vm2679_vm8, %v508_v13  ;;  %vm735_vm8 = vcmask 707584  }
  0xb1   : > { %v511_v17 = vsel %vm401_vm4, %v509_v16, %v510_v15  ;;  %v523_v20 = vpop.permute.xlu0 %522  ;;  %v2093_v21 = vld [vmem:[#allocation3 + $0x8] ss:$12 sps:$4 sm:$0xff]  }
  0xb2   : > { %v513_v18 = vsel %vm512_vm12, %v506_v14, %v511_v17  ;;  %v525_v19 = vpop.permute.xlu1 %524  ;;  %v526_v23 = vrot.slane %v523_v20, 4  ;;  %1989 = vmatpush3.bf16.msra.mxu1 %v2093_v21 }
  0xb3   : > { %516 = vst [vmem:[#allocation3 + $0x24] sm:$0xcc] %v513_v18  ;;  %v527_v22 = vrot.slane %v525_v19, 4  ;;  %534 = vst.msk [vmem:[#allocation3 + $0x38] sm:$0x3] %vm2680_vm2, %v525_v19  ;;  %1990 = vmatprep.subr.bf16.mxu1 %v2196_v28  ;;  %vm740_vm2 = vcmask 551936  }
  0xb5   : > { %v528_v24 = vsel %vm401_vm4, %v526_v23, %v527_v22  ;;  %v2094_v26 = vld [vmem:[#allocation3 + $0x4] ss:$12 sps:$4 sm:$0xff]   ;;  %v2097_v29 = vld [vmem:[#allocation3] ss:$12 sps:$4 sm:$0xff]  }
  0xb6   : > { %v530_v25 = vsel %vm529_vm13, %v523_v20, %v528_v24  ;;  %v2096_v27 = vld [vmem:[#allocation3 + $0x20] ss:$12 sps:$4 sm:$0xff]   ;;  %606 = vmatprep.subr.bf16.mxu0 %v2094_v26  ;;  %v889_v20 = vld [vmem:[%s2671_s5] sm:$0xff] }
  0xb7   : > { %533 = vst [vmem:[#allocation3 + $0x30] sm:$0x33] %v530_v25  ;;  %1991 = vmatpush3.bf16.msra.mxu1 %v2096_v27  ;;  %607 = vmatpush1.bf16.msra.mxu0 %v2097_v29 }
  0xb8   : > { %1992 = vmatprep.subr.bf16.mxu1 %v2196_v28 }
  0xba   : > { %v2098_v30 = vld [vmem:[#allocation3 + $0x1c] ss:$12 sps:$4 sm:$0xff]   ;;  %v2100_v31 = vld [vmem:[#allocation3 + $0x18] ss:$12 sps:$4 sm:$0xff]  }
  0xbb   : > { %v2101_v32 = vld [vmem:[#allocation3 + $0x38] ss:$0 sps:$4 sm:$0x33]   ;;  %608 = vmatprep.subr.bf16.mxu0 %v2098_v30 }
  0xbc   : > { %609 = vmatpush1.bf16.msra.mxu0 %v2100_v31  ;;  %v604_v33 = vsel %vm2678_vm14, %v2101_v32, 0 }
  0xbd   : > { %1993 = vmatpush3.bf16.msra.mxu1 %v604_v33 }
  0xbe   : > { %v544_v34 = vld [vmem:[#allocation3 + $0x30] sm:$0x33]  ;;  %1998 = vmatprep.subr.bf16.mxu1 %v2196_v28 }
  0xbf   : > { %v1900_v36 = vcombine.high %v544_v34, %v544_v34  ;;  %v1899_v37 = vcombine.low %v544_v34, %v544_v34 }
  0xc0   : > { %1995 = vmatmul.mubr.msk.bf16.vlgmr.msra.gmra.mrb[0].mxu1 %vm2677_vm15, %v535_v35 }
  0xc1   : > { %1902 = vmatprep.subr.msk.bf16.mxu0 %vm2678_vm14, %v1900_v36  ;;  %v598_v38 = vsel %vm2678_vm14, %v1899_v37, 0  ;;  %2008 = vmatprep.mubr.msk.bf16.mxu1 %vm2200_vm3, %v2196_v28  ;;  %vm2400_vm14 = vmor %vm732_vm1, %vm731_vm0  ;;  %vm967_vm0 = vcmask 588800  }
  0xc2   : > { %611 = vmatpush1.bf16.msra.mxu0 %v598_v38  ;;  %v550_v40 = vpop.permute.xlu0 %549 }
  0xc5   : > { %1903 = vmatmul.mubr.msk.bf16.vlgmr.msra.gmra.mrb[0].mxu0 %vm2677_vm15, %v535_v35  ;;  %vm726_vm15 = vcmask 154624  }
  0xc6   : > { %1013 = vmatprep.mubr.bf16.mxu0 %v2189_v1 }
 0x193   : > { %v681_v39 = vpop.f32.mrb[0].mxu1 }
 0x194   : > { %v1996_v41 = vpop.f32.mrb[1].mxu1  ;;  %v682_v48 = vadd.f32 %v681_v39, %v550_v40 }
 0x195   : > { %v684_v45 = vpop.f32.mrb[2].mxu1 }
 0x196   : > { %v1997_v46 = vpop.f32.mrb[3].mxu1  ;;  %v689_v59 = vmax.f32 %v682_v48, 0.0 }
 0x198   : > { %v640_v47 = vpop.f32.mrb[0].mxu0  ;;  %v709_v63 = vmul.f32 %v703_v60, %v689_v59 }
 0x199   : > { %v641_v50 = vadd.f32 %v640_v47, %v550_v40  ;;  %v642_v51 = vpop.f32.mrb[1].mxu0 }
 0x19a   : > { %v643_v53 = vadd.f32 %v642_v51, %v550_v40  ;;  %v644_v55 = vpop.f32.mrb[2].mxu0  ;;  %v1963_v4 = vpack.c.bf16 %v709_v63, %v709_v63 }
 0x19b   : > { %v687_v56 = vmax.f32 %v641_v50, 0.0  ;;  %v645_v57 = vpop.f32.mrb[3].mxu0 }
 0x19c   : > { %v688_v58 = vmax.f32 %v643_v53, 0.0 }
 0x19d   : > { %v707_v61 = vmul.f32 %v695_v52, %v687_v56 }
 0x19e   : > { %v708_v62 = vmul.f32 %v699_v54, %v688_v58 }
 0x1a0   : > { %v1962_v0 = vpack.c.bf16 %v708_v62, %v707_v61 }
 0x1a2   : > { %721 = vrot.lane.b32.xlu1 %v1962_v0, %s2201_s27 }
 0x1a6   : > { %723 = vrot.lane.b32.xlu1 %v1963_v4, %s2201_s27 }
 0x214   : > { %v722_v2 = vpop.permute.xlu1 %721 }
 0x215   : > { %v725_v3 = vrot.slane %v722_v2, 4 }
 0x217   : > { %v727_v7 = vsel %vm726_vm15, %v725_v3, %v722_v2 }
 0x218   : > { %v724_v8 = vpop.permute.xlu1 %723  ;;  %734 = vst.msk [vmem:[#allocation2] sm:$0xff] %vm2400_vm14, %v727_v7 }
 0x219   : > { %v728_v9 = vsel %vm726_vm15, %v725_v3, %v724_v8 }
 0x21a   : > { %736 = vst.msk [vmem:[#allocation2 + $0x8] sm:$0xf] %vm735_vm8, %v728_v9 }
 0x21f   : > { %v742_v10 = vld [vmem:[#allocation2] sm:$0xff] }
 0x220   : > { %746 = vrot.lane.b32.xlu0 %v742_v10, %s2194_s18 }
 0x221   : > { %v743_v11 = vld [vmem:[#allocation2 + $0x8] sm:$0xf] }
 0x222   : > { %748 = vrot.lane.b32.xlu1 %v743_v11, %s2194_s18  ;;  %v738_v12 = vld [vmem:[#allocation2 + $0x8] sm:$0xf] }
 0x223   : > { %741 = vst.msk [vmem:[#allocation3 + $0x8] sm:$0xf] %vm740_vm2, %v738_v12  ;;  %v759_v13 = vld [vmem:[#allocation2 + $0x8] sm:$0xf] }
 0x224   : > { %762 = vrot.lane.b32.xlu0 %v742_v10, %s2192_s11  ;;  %v775_v14 = vld [vmem:[#allocation2 + $0x8] sm:$0xf] }
 0x225   : > { %v791_v15 = vld [vmem:[#allocation2 + $0x8] sm:$0xf] }
 0x226   : > { %764 = vrot.lane.b32.xlu1 %v759_v13, %s2192_s11  ;;  %v807_v16 = vld [vmem:[#allocation2 + $0x8] sm:$0xf] }
 0x227   : > { %v823_v17 = vld [vmem:[#allocation2 + $0x8] sm:$0xf] }
 0x228   : > { %778 = vrot.lane.b32.xlu0 %v742_v10, %s2195_s20  ;;  %v839_v18 = vld [vmem:[#allocation2 + $0x8] sm:$0xf] }
 0x229   : > { %v855_v19 = vld [vmem:[#allocation2 + $0x8] sm:$0xf] }
 0x22a   : > { %780 = vrot.lane.b32.xlu1 %v775_v14, %s2195_s20 }
 0x22c   : > { %794 = vrot.lane.b32.xlu0 %v742_v10, %s2191_s30 }
 0x22e   : > { %796 = vrot.lane.b32.xlu1 %v791_v15, %s2191_s30 }
 0x230   : > { %810 = vrot.lane.b32.xlu0 %v742_v10, %s2197_s21 }
 0x232   : > { %812 = vrot.lane.b32.xlu1 %v807_v16, %s2197_s21 }
 0x234   : > { %826 = vrot.lane.b32.xlu0 %v742_v10, %s2193_s12 }
 0x236   : > { %828 = vrot.lane.b32.xlu1 %v823_v17, %s2193_s12 }
 0x238   : > { %842 = vrot.lane.b32.xlu0 %v742_v10, %s2683_s25 }
 0x23a   : > { %844 = vrot.lane.b32.xlu1 %v839_v18, %s2683_s25 }
 0x23c   : > { %858 = vrot.lane.b32.xlu0 %v742_v10, %s2681_s26 }
 0x23e   : > { %860 = vrot.lane.b32.xlu1 %v855_v19, %s2681_s26 }
 0x240   : > { %892 = vperm.xlu0 %2091, %v889_v20  }
 0x292   : > { %v747_v21 = vpop.permute.xlu0 %746 }
 0x293   : > { %v750_v23 = vrot.slane %v747_v21, 4 }
 0x294   : > { %v749_v22 = vpop.permute.xlu1 %748 }
 0x295   : > { %v751_v24 = vrot.slane %v749_v22, 4  ;;  %757 = vst.msk [vmem:[#allocation3 + $0x14] sm:$0xf] %vm740_vm2, %v749_v22 }
 0x296   : > { %v763_v25 = vpop.permute.xlu0 %762 }
 0x297   : > { %v752_v26 = vsel %vm401_vm4, %v750_v23, %v751_v24  ;;  %v766_v34 = vrot.slane %v763_v25, 4 }
 0x298   : > { %v753_v27 = vsel %vm403_vm11, %v747_v21, %v752_v26  ;;  %v765_v29 = vpop.permute.xlu1 %764  ;;  %v870_v26 = vld [vmem:[%s2670_s4] sm:$0xf] }
 0x299   : > { %v767_v30 = vrot.slane %v765_v29, 4  ;;  %773 = vst.msk [vmem:[#allocation3 + $0x20] sm:$0xf] %vm740_vm2, %v765_v29  ;;  %v1908_v31 = vcombine.high %v742_v10, %v753_v27  ;;  %v1907_v32 = vcombine.low %v742_v10, %v753_v27 }
 0x29a   : > { %v779_v33 = vpop.permute.xlu0 %778 }
 0x29b   : > { %981 = vmatprep.subr.bf16.mxu0 %v1908_v31  ;;  %v768_v37 = vsel %vm401_vm4, %v766_v34, %v767_v30  ;;  %v782_v38 = vrot.slane %v779_v33, 4  ;;  %v1065_v31 = vld [vmem:[%s2667_s1] sm:$0x7] }
 0x29c   : > { %v781_v35 = vpop.permute.xlu1 %780  ;;  %v2104_v36 = vld [vmem:[#allocation3 + $0x8] ss:$12 sps:$4 sm:$0xff]   ;;  %982 = vmatpush1.bf16.msra.mxu0 %v1907_v32  ;;  %v769_v43 = vsel %vm421_vm5, %v763_v25, %v768_v37 }
 0x29d   : > { %v783_v39 = vrot.slane %v781_v35, 4  ;;  %789 = vst.msk [vmem:[#allocation3 + $0x2c] sm:$0xf] %vm740_vm2, %v781_v35  ;;  %1999 = vmatpush3.bf16.msra.mxu1 %v2104_v36  ;;  %v1070_v35 = vrot.slane %v1065_v31, %v2384_v42 }
 0x29e   : > { %v795_v40 = vpop.permute.xlu0 %794  ;;  %2000 = vmatprep.subr.bf16.mxu1 %v2196_v28 }
 0x29f   : > { %v784_v41 = vsel %vm401_vm4, %v782_v38, %v783_v39  ;;  %v798_v52 = vrot.slane %v795_v40, 4  ;;  %v1074_v38 = vrot.slane %v1065_v31, %v2390_v44 }
 0x2a0   : > { %v785_v45 = vsel %vm440_vm9, %v779_v33, %v784_v41  ;;  %v797_v46 = vpop.permute.xlu1 %796 }
 0x2a1   : > { %v799_v47 = vrot.slane %v797_v46, 4  ;;  %805 = vst.msk [vmem:[#allocation3 + $0x38] sm:$0xf] %vm740_vm2, %v797_v46  ;;  %v1911_v48 = vcombine.high %v769_v43, %v785_v45  ;;  %v1910_v50 = vcombine.low %v769_v43, %v785_v45  ;;  %v1078_v46 = vrot.slane %v1065_v31, %v2393_v49 }
 0x2a2   : > { %v811_v51 = vpop.permute.xlu0 %810 }
 0x2a3   : > { %983 = vmatprep.subr.bf16.mxu0 %v1911_v48  ;;  %v800_v55 = vsel %vm401_vm4, %v798_v52, %v799_v47  ;;  %v814_v56 = vrot.slane %v811_v51, 4 }
 0x2a4   : > { %v813_v53 = vpop.permute.xlu1 %812  ;;  %v2105_v54 = vld [vmem:[#allocation3 + $0x20] ss:$12 sps:$4 sm:$0xff]   ;;  %984 = vmatpush1.bf16.msra.mxu0 %v1910_v50  ;;  %v801_v60 = vsel %vm457_vm6, %v795_v40, %v800_v55 }
 0x2a5   : > { %v815_v57 = vrot.slane %v813_v53, 4  ;;  %821 = vst.msk [vmem:[#allocation3 + $0x44] sm:$0xf] %vm740_vm2, %v813_v53  ;;  %2001 = vmatpush3.bf16.msra.mxu1 %v2105_v54 }
 0x2a6   : > { %v827_v58 = vpop.permute.xlu0 %826  ;;  %2002 = vmatprep.subr.bf16.mxu1 %v2196_v28 }
 0x2a7   : > { %v816_v59 = vsel %vm401_vm4, %v814_v56, %v815_v57  ;;  %v830_v3 = vrot.slane %v827_v58, 4 }
 0x2a8   : > { %v817_v61 = vsel %vm476_vm10, %v811_v51, %v816_v59  ;;  %v829_v62 = vpop.permute.xlu1 %828 }
 0x2a9   : > { %v831_v63 = vrot.slane %v829_v62, 4  ;;  %837 = vst.msk [vmem:[#allocation3 + $0x50] sm:$0xf] %vm740_vm2, %v829_v62  ;;  %v1914_v0 = vcombine.high %v801_v60, %v817_v61  ;;  %v1913_v4 = vcombine.low %v801_v60, %v817_v61 }
 0x2aa   : > { %v843_v2 = vpop.permute.xlu0 %842 }
 0x2ab   : > { %985 = vmatprep.subr.bf16.mxu0 %v1914_v0  ;;  %v832_v9 = vsel %vm401_vm4, %v830_v3, %v831_v63  ;;  %v846_v10 = vrot.slane %v843_v2, 4 }
 0x2ac   : > { %v845_v7 = vpop.permute.xlu1 %844  ;;  %v2106_v8 = vld [vmem:[#allocation3 + $0x38] ss:$12 sps:$4 sm:$0xff]   ;;  %986 = vmatpush1.bf16.msra.mxu0 %v1913_v4  ;;  %v833_v14 = vsel %vm493_vm7, %v827_v58, %v832_v9 }
 0x2ad   : > { %v847_v11 = vrot.slane %v845_v7, 4  ;;  %853 = vst.msk [vmem:[#allocation3 + $0x5c] sm:$0xf] %vm740_vm2, %v845_v7  ;;  %2003 = vmatpush3.bf16.msra.mxu1 %v2106_v8 }
 0x2ae   : > { %v859_v12 = vpop.permute.xlu0 %858  ;;  %2004 = vmatprep.subr.bf16.mxu1 %v2196_v28 }
 0x2af   : > { %v848_v13 = vsel %vm401_vm4, %v846_v10, %v847_v11  ;;  %v862_v17 = vrot.slane %v859_v12, 4  ;;  %v1258_v11 = vld [vmem:[%s2673_s7] sm:$0xf] }
 0x2b0   : > { %v849_v15 = vsel %vm512_vm12, %v843_v2, %v848_v13  ;;  %v861_v16 = vpop.permute.xlu1 %860 }
 0x2b1   : > { %v863_v18 = vrot.slane %v861_v16, 4  ;;  %869 = vst.msk [vmem:[#allocation3 + $0x68] sm:$0xf] %vm740_vm2, %v861_v16  ;;  %v1917_v19 = vcombine.high %v833_v14, %v849_v15  ;;  %v1916_v20 = vcombine.low %v833_v14, %v849_v15 }
 0x2b3   : > { %v864_v21 = vsel %vm401_vm4, %v862_v17, %v863_v18  ;;  %987 = vmatprep.subr.bf16.mxu0 %v1917_v19 }
 0x2b4   : > { %v865_v22 = vsel %vm529_vm13, %v859_v12, %v864_v21  ;;  %v2107_v23 = vld [vmem:[#allocation3 + $0x50] ss:$12 sps:$4 sm:$0xff]   ;;  %988 = vmatpush1.bf16.msra.mxu0 %v1916_v20 }
 0x2b5   : > { %v1920_v24 = vcombine.high %v865_v22, %v865_v22  ;;  %v1919_v25 = vcombine.low %v865_v22, %v865_v22  ;;  %2005 = vmatpush3.bf16.msra.mxu1 %v2107_v23 }
 0x2b6   : > { %2006 = vmatprep.subr.bf16.mxu1 %v2196_v28 }
 0x2b7   : > { %1922 = vmatprep.subr.msk.bf16.mxu0 %vm401_vm4, %v1920_v24  ;;  %v973_v27 = vsel %vm401_vm4, %v1919_v25, 0 }
 0x2b8   : > { %v2108_v29 = vld [vmem:[#allocation3 + $0x68] ss:$0 sps:$4 sm:$0xff]   ;;  %990 = vmatpush1.bf16.msra.mxu0 %v973_v27 }
 0x2b9   : > { %v979_v30 = vsel %vm401_vm4, %v2108_v29, 0 }
 0x2ba   : > { %2007 = vmatpush3.bf16.msra.mxu1 %v979_v30 }
 0x2bb   : > { %1923 = vmatmul.mubr.msk.bf16.vlgmr.msra.gmra.mrb[4].mxu0 %vm967_vm0, %v870_v26  ;;  %2012 = vmatprep.subr.bf16.mxu1 %v2196_v28 }
 0x2bc   : > { %1380 = vmatprep.mubr.bf16.mxu0 %v2189_v1 }
 0x2bd   : > { %2009 = vmatmul.mubr.msk.bf16.vlgmr.msra.gmra.mrb[4].mxu1 %vm967_vm0, %v870_v26 }
 0x2be   : > { %2022 = vmatprep.mubr.msk.bf16.mxu1 %vm2200_vm3, %v2196_v28 }
 0x2bf   : > { %v893_v32 = vpop.permute.xlu0 %892 }
 0x38e   : > { %v1015_v33 = vpop.f32.mrb[4].mxu0 }
 0x38f   : > { %v1016_v34 = vadd.f32 %v1015_v33, %v893_v32  ;;  %v1017_v36 = vpop.f32.mrb[5].mxu0 }
 0x390   : > { %v1018_v37 = vadd.f32 %v1017_v36, %v893_v32  ;;  %v1019_v39 = vpop.f32.mrb[6].mxu0  ;;  %v1056_v40 = vpop.f32.mrb[4].mxu1 }
 0x391   : > { %v1062_v41 = vmax.f32 %v1016_v34, 0.0  ;;  %v1020_v43 = vpop.f32.mrb[7].mxu0  ;;  %v1057_v45 = vadd.f32 %v1056_v40, %v893_v32  ;;  %v2010_v48 = vpop.f32.mrb[5].mxu1 }
 0x392   : > { %v1063_v47 = vmax.f32 %v1018_v37, 0.0  ;;  %v1059_v51 = vpop.f32.mrb[6].mxu1 }
 0x393   : > { %v1082_v50 = vmul.f32 %v1070_v35, %v1062_v41  ;;  %v1064_v52 = vmax.f32 %v1057_v45, 0.0  ;;  %v2011_v54 = vpop.f32.mrb[7].mxu1 }
 0x394   : > { %v1083_v53 = vmul.f32 %v1074_v38, %v1063_v47 }
 0x395   : > { %v1084_v55 = vmul.f32 %v1078_v46, %v1064_v52 }
 0x396   : > { %v1964_v56 = vpack.c.bf16 %v1083_v53, %v1082_v50 }
 0x397   : > { %v1965_v57 = vpack.c.bf16 %v1084_v55, %v1084_v55 }
 0x398   : > { %1096 = vrot.lane.b32.xlu1 %v1964_v56, %s2201_s27 }
 0x399   : > { %1098 = vrot.lane.b32.xlu0 %v1965_v57, %s2201_s27 }
 0x40a   : > { %v1097_v58 = vpop.permute.xlu1 %1096 }
 0x40b   : > { %v1100_v59 = vrot.slane %v1097_v58, 4  ;;  %v1099_v60 = vpop.permute.xlu0 %1098 }
 0x40d   : > { %v1101_v61 = vsel %vm726_vm15, %v1100_v59, %v1097_v58  ;;  %v1102_v62 = vsel %vm726_vm15, %v1100_v59, %v1099_v60 }
 0x40e   : > { %1105 = vst.msk [vmem:[#allocation2] sm:$0xff] %vm2400_vm14, %v1101_v61  ;;  %vm1476_vm14 = vcmask 705536  }
 0x40f   : > { %1106 = vst.msk [vmem:[#allocation2 + $0x8] sm:$0xf] %vm735_vm8, %v1102_v62 }
 0x415   : > { %v1111_v63 = vld [vmem:[#allocation2] sm:$0xff] }
 0x416   : > { %v1112_v0 = vld [vmem:[#allocation2 + $0x8] sm:$0xf]  ;;  %1115 = vrot.lane.b32.xlu1 %v1111_v63, %s2194_s18  ;;  %1109 = vst [vmem:[#allocation3] sm:$0xff] %v1111_v63 }
 0x417   : > { %1117 = vrot.lane.b32.xlu0 %v1112_v0, %s2194_s18  ;;  %v1108_v4 = vld [vmem:[#allocation2 + $0x8] sm:$0xf] }
 0x418   : > { %v1128_v2 = vld [vmem:[#allocation2 + $0x8] sm:$0xf]  ;;  %1110 = vst.msk [vmem:[#allocation3 + $0x8] sm:$0xf] %vm740_vm2, %v1108_v4 }
 0x419   : > { %v1144_v3 = vld [vmem:[#allocation2 + $0x8] sm:$0xf] }
 0x41a   : > { %1131 = vrot.lane.b32.xlu1 %v1111_v63, %s2192_s11  ;;  %v1160_v5 = vld [vmem:[#allocation2 + $0x8] sm:$0xf] }
 0x41b   : > { %1133 = vrot.lane.b32.xlu0 %v1128_v2, %s2192_s11  ;;  %v1176_v7 = vld [vmem:[#allocation2 + $0x8] sm:$0xf] }
 0x41c   : > { %v1192_v8 = vld [vmem:[#allocation2 + $0x8] sm:$0xf] }
 0x41d   : > { %v1208_v9 = vld [vmem:[#allocation2 + $0x8] sm:$0xf] }
 0x41e   : > { %1147 = vrot.lane.b32.xlu1 %v1111_v63, %s2195_s20  ;;  %v1224_v10 = vld [vmem:[#allocation2 + $0x8] sm:$0xf] }
 0x41f   : > { %1149 = vrot.lane.b32.xlu0 %v1144_v3, %s2195_s20 }
 0x422   : > { %1163 = vrot.lane.b32.xlu1 %v1111_v63, %s2191_s30 }
 0x423   : > { %1165 = vrot.lane.b32.xlu0 %v1160_v5, %s2191_s30 }
 0x426   : > { %1179 = vrot.lane.b32.xlu1 %v1111_v63, %s2197_s21 }
 0x427   : > { %1181 = vrot.lane.b32.xlu0 %v1176_v7, %s2197_s21 }
 0x42a   : > { %1195 = vrot.lane.b32.xlu1 %v1111_v63, %s2193_s12 }
 0x42b   : > { %1197 = vrot.lane.b32.xlu0 %v1192_v8, %s2193_s12 }
 0x42e   : > { %1211 = vrot.lane.b32.xlu1 %v1111_v63, %s2683_s25 }
 0x42f   : > { %1213 = vrot.lane.b32.xlu0 %v1208_v9, %s2683_s25  ;;  %s2202_s25 = smov [#allocation4]  }
 0x432   : > { %1227 = vrot.lane.b32.xlu1 %v1111_v63, %s2681_s26 }
 0x433   : > { %1229 = vrot.lane.b32.xlu0 %v1224_v10, %s2681_s26  ;;  %s2129_s26 = sshll.u32 %s2202_s25, 4  ;;  %s2130_s26 = int_to_ptr.vmem [resolvable:$false] %s2129_s26 }
 0x436   : > { %1261 = vperm.xlu1 %2092, %v1258_v11  }
 0x488   : > { %v1116_v12 = vpop.permute.xlu1 %1115 }
 0x489   : > { %v1118_v13 = vpop.permute.xlu0 %1117  ;;  %v1119_v14 = vrot.slane %v1116_v12, 4 }
 0x48a   : > { %v1120_v15 = vrot.slane %v1118_v13, 4  ;;  %1126 = vst.msk [vmem:[#allocation3 + $0x14] sm:$0xf] %vm740_vm2, %v1118_v13 }
 0x48c   : > { %v1121_v16 = vsel %vm401_vm4, %v1119_v14, %v1120_v15  ;;  %v1132_v18 = vpop.permute.xlu1 %1131 }
 0x48d   : > { %v1122_v17 = vsel %vm403_vm11, %v1116_v12, %v1121_v16  ;;  %v1134_v19 = vpop.permute.xlu0 %1133  ;;  %v1135_v20 = vrot.slane %v1132_v18, 4 }
 0x48e   : > { %1125 = vst [vmem:[#allocation3 + $0xc] sm:$0xff] %v1122_v17  ;;  %v1136_v21 = vrot.slane %v1134_v19, 4  ;;  %1142 = vst.msk [vmem:[#allocation3 + $0x20] sm:$0xf] %vm740_vm2, %v1134_v19  ;;  %v1928_v22 = vcombine.high %v1111_v63, %v1122_v17  ;;  %v1927_v23 = vcombine.low %v1111_v63, %v1122_v17 }
 0x490   : > { %v1137_v24 = vsel %vm401_vm4, %v1135_v20, %v1136_v21  ;;  %1348 = vmatprep.subr.bf16.mxu0 %v1928_v22  ;;  %v1148_v26 = vpop.permute.xlu1 %1147  ;;  %v1432_v21 = vld [vmem:[%s2667_s1] sm:$0x7] }
 0x491   : > { %v1138_v25 = vsel %vm421_vm5, %v1132_v18, %v1137_v24  ;;  %v1150_v27 = vpop.permute.xlu0 %1149  ;;  %v2109_v29 = vld [vmem:[#allocation3 + $0x8] ss:$12 sps:$4 sm:$0xff]   ;;  %1349 = vmatpush1.bf16.msra.mxu0 %v1927_v23  ;;  %v1151_v30 = vrot.slane %v1148_v26, 4  ;;  %v1437_v24 = vrot.slane %v1432_v21, %v2384_v42 }
 0x492   : > { %1141 = vst [vmem:[#allocation3 + $0x18] sm:$0xff] %v1138_v25  ;;  %v1152_v31 = vrot.slane %v1150_v27, 4  ;;  %1158 = vst.msk [vmem:[#allocation3 + $0x2c] sm:$0xf] %vm740_vm2, %v1150_v27  ;;  %2013 = vmatpush3.bf16.msra.mxu1 %v2109_v29  ;;  %v1239_v18 = vld [vmem:[%s2672_s6] sm:$0x3]  ;;  %v1441_v27 = vrot.slane %v1432_v21, %v2390_v44 }
 0x493   : > { %2014 = vmatprep.subr.bf16.mxu1 %v2196_v28 }
 0x494   : > { %v1153_v32 = vsel %vm401_vm4, %v1151_v30, %v1152_v31  ;;  %v1164_v34 = vpop.permute.xlu1 %1163 }
 0x495   : > { %v1154_v33 = vsel %vm440_vm9, %v1148_v26, %v1153_v32  ;;  %v1166_v35 = vpop.permute.xlu0 %1165  ;;  %v1167_v36 = vrot.slane %v1164_v34, 4 }
 0x496   : > { %1157 = vst [vmem:[#allocation3 + $0x24] sm:$0xff] %v1154_v33  ;;  %v1168_v37 = vrot.slane %v1166_v35, 4  ;;  %1174 = vst.msk [vmem:[#allocation3 + $0x38] sm:$0xf] %vm740_vm2, %v1166_v35  ;;  %v1931_v38 = vcombine.high %v1138_v25, %v1154_v33  ;;  %v1930_v39 = vcombine.low %v1138_v25, %v1154_v33  ;;  %v1445_v33 = vrot.slane %v1432_v21, %v2393_v49 }
 0x498   : > { %v1169_v40 = vsel %vm401_vm4, %v1167_v36, %v1168_v37  ;;  %1350 = vmatprep.subr.bf16.mxu0 %v1931_v38  ;;  %v1180_v43 = vpop.permute.xlu1 %1179 }
 0x499   : > { %v1170_v41 = vsel %vm457_vm6, %v1164_v34, %v1169_v40  ;;  %v1182_v45 = vpop.permute.xlu0 %1181  ;;  %v2110_v46 = vld [vmem:[#allocation3 + $0x20] ss:$12 sps:$4 sm:$0xff]   ;;  %1351 = vmatpush1.bf16.msra.mxu0 %v1930_v39  ;;  %v1183_v47 = vrot.slane %v1180_v43, 4 }
 0x49a   : > { %1173 = vst [vmem:[#allocation3 + $0x30] sm:$0xff] %v1170_v41  ;;  %v1184_v48 = vrot.slane %v1182_v45, 4  ;;  %1190 = vst.msk [vmem:[#allocation3 + $0x44] sm:$0xf] %vm740_vm2, %v1182_v45  ;;  %2015 = vmatpush3.bf16.msra.mxu1 %v2110_v46 }
 0x49b   : > { %2016 = vmatprep.subr.bf16.mxu1 %v2196_v28 }
 0x49c   : > { %v1185_v50 = vsel %vm401_vm4, %v1183_v47, %v1184_v48  ;;  %v1196_v52 = vpop.permute.xlu1 %1195 }
 0x49d   : > { %v1186_v51 = vsel %vm476_vm10, %v1180_v43, %v1185_v50  ;;  %v1198_v53 = vpop.permute.xlu0 %1197  ;;  %v1199_v54 = vrot.slane %v1196_v52, 4 }
 0x49e   : > { %v1200_v55 = vrot.slane %v1198_v53, 4  ;;  %1206 = vst.msk [vmem:[#allocation3 + $0x50] sm:$0xf] %vm740_vm2, %v1198_v53  ;;  %v1933_v56 = vcombine.low %v1170_v41, %v1186_v51  ;;  %v1934_v57 = vcombine.high %v1170_v41, %v1186_v51 }
 0x4a0   : > { %v1201_v58 = vsel %vm401_vm4, %v1199_v54, %v1200_v55  ;;  %1352 = vmatprep.subr.bf16.mxu0 %v1934_v57  ;;  %v1212_v60 = vpop.permute.xlu1 %1211 }
 0x4a1   : > { %v1202_v59 = vsel %vm493_vm7, %v1196_v52, %v1201_v58  ;;  %v1214_v61 = vpop.permute.xlu0 %1213  ;;  %v2111_v62 = vld [vmem:[#allocation3 + $0x38] ss:$12 sps:$4 sm:$0xff]   ;;  %1353 = vmatpush1.bf16.msra.mxu0 %v1933_v56  ;;  %v1215_v63 = vrot.slane %v1212_v60, 4 }
 0x4a2   : > { %v1216_v0 = vrot.slane %v1214_v61, 4  ;;  %1222 = vst.msk [vmem:[#allocation3 + $0x5c] sm:$0xf] %vm740_vm2, %v1214_v61  ;;  %2017 = vmatpush3.bf16.msra.mxu1 %v2111_v62 }
 0x4a3   : > { %2018 = vmatprep.subr.bf16.mxu1 %v2196_v28 }
 0x4a4   : > { %v1217_v4 = vsel %vm401_vm4, %v1215_v63, %v1216_v0  ;;  %v1228_v3 = vpop.permute.xlu1 %1227 }
 0x4a5   : > { %v1218_v2 = vsel %vm512_vm12, %v1212_v60, %v1217_v4  ;;  %v1230_v5 = vpop.permute.xlu0 %1229  ;;  %v1231_v7 = vrot.slane %v1228_v3, 4 }
 0x4a6   : > { %v1232_v8 = vrot.slane %v1230_v5, 4  ;;  %1238 = vst.msk [vmem:[#allocation3 + $0x68] sm:$0xf] %vm740_vm2, %v1230_v5  ;;  %v1936_v9 = vcombine.low %v1202_v59, %v1218_v2  ;;  %v1937_v10 = vcombine.high %v1202_v59, %v1218_v2  ;;  %vm1472_vm2 = vcmask 1041560  }
 0x4a8   : > { %v1233_v11 = vsel %vm401_vm4, %v1231_v7, %v1232_v8  ;;  %1354 = vmatprep.subr.bf16.mxu0 %v1937_v10 }
 0x4a9   : > { %v1234_v12 = vsel %vm529_vm13, %v1228_v3, %v1233_v11  ;;  %v2112_v13 = vld [vmem:[#allocation3 + $0x50] ss:$12 sps:$4 sm:$0xff]   ;;  %1355 = vmatpush1.bf16.msra.mxu0 %v1936_v9 }
 0x4aa   : > { %v1940_v14 = vcombine.high %v1234_v12, %v1234_v12  ;;  %v1939_v15 = vcombine.low %v1234_v12, %v1234_v12  ;;  %2019 = vmatpush3.bf16.msra.mxu1 %v2112_v13 }
 0x4ab   : > { %2020 = vmatprep.subr.bf16.mxu1 %v2196_v28 }
 0x4ac   : > { %1942 = vmatprep.subr.msk.bf16.mxu0 %vm401_vm4, %v1940_v14  ;;  %v1340_v16 = vsel %vm401_vm4, %v1939_v15, 0 }
 0x4ad   : > { %v2113_v17 = vld [vmem:[#allocation3 + $0x68] ss:$0 sps:$4 sm:$0xff]   ;;  %1357 = vmatpush1.bf16.msra.mxu0 %v1340_v16  ;;  %v1629_v16 = vld [vmem:[%s2675_s9] sm:$0x3] }
 0x4ae   : > { %v1346_v19 = vsel %vm401_vm4, %v2113_v17, 0 }
 0x4af   : > { %2021 = vmatpush3.bf16.msra.mxu1 %v1346_v19 }
 0x4b0   : > { %1943 = vmatmul.mubr.msk.bf16.vlgmr.msra.gmra.mrb[8].mxu0 %vm967_vm0, %v1239_v18  ;;  %2026 = vmatprep.subr.bf16.mxu1 %v2196_v28 }
 0x4b1   : > { %1719 = vmatprep.mubr.bf16.mxu0 %v2189_v1 }
 0x4b2   : > { %2023 = vmatmul.mubr.msk.bf16.vlgmr.msra.gmra.mrb[8].mxu1 %vm967_vm0, %v1239_v18 }
 0x4b3   : > { %2032 = vmatprep.mubr.msk.bf16.mxu1 %vm2200_vm3, %v2196_v28  ;;  %vm1473_vm3 = vcmask 1045508  }
 0x4b4   : > { %vm1474_vm8 = vmor %vm1473_vm3, %vm1472_vm2 }
 0x4b5   : > { %v1262_v20 = vpop.permute.xlu1 %1261 }
 0x583   : > { %v1382_v22 = vpop.f32.mrb[8].mxu0 }
 0x584   : > { %v1383_v23 = vadd.f32 %v1382_v22, %v1262_v20  ;;  %v1384_v25 = vpop.f32.mrb[9].mxu0 }
 0x585   : > { %v1385_v26 = vadd.f32 %v1384_v25, %v1262_v20  ;;  %v1386_v29 = vpop.f32.mrb[10].mxu0  ;;  %v1423_v30 = vpop.f32.mrb[8].mxu1 }
 0x586   : > { %v1429_v1 = vmax.f32 %v1383_v23, 0.0  ;;  %v1387_v31 = vpop.f32.mrb[11].mxu0  ;;  %v1424_v32 = vadd.f32 %v1423_v30, %v1262_v20  ;;  %v2024_v35 = vpop.f32.mrb[9].mxu1 }
 0x587   : > { %v1430_v34 = vmax.f32 %v1385_v26, 0.0  ;;  %v1426_v37 = vpop.f32.mrb[10].mxu1 }
 0x588   : > { %v1449_v36 = vmul.f32 %v1437_v24, %v1429_v1  ;;  %v1431_v38 = vmax.f32 %v1424_v32, 0.0  ;;  %v2025_v40 = vpop.f32.mrb[11].mxu1 }
 0x589   : > { %v1450_v39 = vmul.f32 %v1441_v27, %v1430_v34 }
 0x58a   : > { %v1451_v41 = vmul.f32 %v1445_v33, %v1431_v38 }
 0x58b   : > { %v1966_v43 = vpack.c.bf16 %v1450_v39, %v1449_v36 }
 0x58c   : > { %v1967_v45 = vpack.c.bf16 %v1451_v41, %v1451_v41 }
 0x58d   : > { %1463 = vrot.lane.b32.xlu0 %v1966_v43, %s2201_s27 }
 0x58e   : > { %1465 = vrot.lane.b32.xlu1 %v1967_v45, %s2201_s27  ;;  %s350_s27 = sand.u32 1, %s2179_s14  }
 0x58f   : > { %s2036_s28 = smul.u32 6, %s350_s27  ;;  %s1814_s17 = scalar_lea.sflag [#allocation5], %s350_s27 }
 0x5ff   : > { %v1464_v46 = vpop.permute.xlu0 %1463 }
 0x600   : > { %v1467_v47 = vrot.slane %v1464_v46, 4  ;;  %v1466_v48 = vpop.permute.xlu1 %1465 }
 0x602   : > { %v1468_v50 = vsel %vm726_vm15, %v1467_v47, %v1464_v46  ;;  %v1469_v51 = vsel %vm726_vm15, %v1467_v47, %v1466_v48  ;;  %vm2689_vm15 = vcmask 549888  }
 0x603   : > { %1475 = vst.msk [vmem:[#allocation2] sm:$0x33] %vm1474_vm8, %v1468_v50  ;;  %vm2692_vm1 = vmmov %vm2689_vm15  ;;  %vm1808_vm8 = vcmask 1043458  }
 0x604   : > { %1477 = vst.msk [vmem:[#allocation2 + $0x8] sm:$0x3] %vm1476_vm14, %v1469_v51  ;;  %vm2693_vm0 = vmmov %vm2692_vm1 }
 0x605   : > { %vm2694_vm2 = vmmov %vm2693_vm0 }
 0x60a   : > { %v1500_v52 = vld [vmem:[#allocation2] sm:$0x33] }
 0x60b   : > { %v1501_v53 = vld [vmem:[#allocation2 + $0x8] sm:$0x3]  ;;  %1504 = vrot.lane.b32.xlu0 %v1500_v52, %s2192_s11  ;;  %v1534_v54 = vld [vmem:[#allocation2] sm:$0x33] }
 0x60c   : > { %1506 = vrot.lane.b32.xlu1 %v1501_v53, %s2192_s11  ;;  %v1535_v55 = vld [vmem:[#allocation2 + $0x8] sm:$0x3]  ;;  %v1568_v56 = vld [vmem:[#allocation2] sm:$0x33]  ;;  %s2691_s11 = smov 90  }
 0x60d   : > { %v1479_v57 = vld [vmem:[#allocation2 + $0x8] sm:$0x3]  ;;  %v1478_v58 = vld [vmem:[#allocation2] sm:$0x33] }
 0x60e   : > { %v1569_v59 = vld [vmem:[#allocation2 + $0x8] sm:$0x3]  ;;  %v1482_v60 = vld [vmem:[#allocation2] sm:$0x33]  ;;  %1481 = vst.msk [vmem:[#allocation3 + $0x8] sm:$0x3] %vm2689_vm15, %v1479_v57 }
 0x60f   : > { %1538 = vrot.lane.b32.xlu0 %v1534_v54, %s2191_s30  ;;  %v1483_v61 = vld [vmem:[#allocation2 + $0x8] sm:$0x3]  ;;  %1480 = vst [vmem:[#allocation3] sm:$0x33] %v1478_v58  ;;  %v1486_v62 = vrot.slane %v1482_v60, 6 }
 0x610   : > { %1540 = vrot.lane.b32.xlu1 %v1535_v55, %s2191_s30  ;;  %v1487_v63 = vrot.slane %v1483_v61, 6  ;;  %v1516_v0 = vld [vmem:[#allocation2] sm:$0x33]  ;;  %v1517_v4 = vld [vmem:[#allocation2 + $0x8] sm:$0x3]  ;;  %s2690_s30 = smov 91  }
 0x611   : > { %v1520_v2 = vrot.slane %v1516_v0, 6  ;;  %v1521_v3 = vrot.slane %v1517_v4, 6  ;;  %v1550_v5 = vld [vmem:[#allocation2] sm:$0x33]  ;;  %v1551_v7 = vld [vmem:[#allocation2 + $0x8] sm:$0x3] }
 0x612   : > { %v1554_v8 = vrot.slane %v1550_v5, 6  ;;  %v1555_v9 = vrot.slane %v1551_v7, 6  ;;  %v1584_v10 = vld [vmem:[#allocation2] sm:$0x33]  ;;  %v1585_v11 = vld [vmem:[#allocation2 + $0x8] sm:$0x3] }
 0x613   : > { %1572 = vrot.lane.b32.xlu0 %v1568_v56, %s2193_s12  ;;  %v1588_v12 = vrot.slane %v1584_v10, 6  ;;  %v1589_v13 = vrot.slane %v1585_v11, 6  ;;  %v1602_v14 = vld [vmem:[#allocation2] sm:$0x33]  ;;  %v1603_v15 = vld [vmem:[#allocation2 + $0x8] sm:$0x3] }
 0x614   : > { %1574 = vrot.lane.b32.xlu1 %v1569_v59, %s2193_s12 }
 0x617   : > { %1488 = vrot.lane.b32.xlu0 %v1486_v62, %s2194_s18 }
 0x618   : > { %1490 = vrot.lane.b32.xlu1 %v1487_v63, %s2194_s18 }
 0x61b   : > { %1522 = vrot.lane.b32.xlu0 %v1520_v2, %s2195_s20 }
 0x61c   : > { %1524 = vrot.lane.b32.xlu1 %v1521_v3, %s2195_s20  ;;  %s2622_s20 = scalar_lea.hbm %s2676_s10, %s2038_s29 }
 0x61f   : > { %1556 = vrot.lane.b32.xlu0 %v1554_v8, %s2197_s21 }
 0x620   : > { %1558 = vrot.lane.b32.xlu1 %v1555_v9, %s2197_s21 }
 0x623   : > { %1590 = vrot.lane.b32.xlu0 %v1588_v12, %s2690_s30 }
 0x624   : > { %1592 = vrot.lane.b32.xlu1 %v1589_v13, %s2690_s30  ;;  %s352_s30 = scalar_lea.vmem [#allocation4], %s2036_s28  ;;  %s2131_s28 = scalar_lea.vmem %s2130_s26, 192 }
 0x627   : > { %1606 = vrot.lane.b32.xlu0 %v1602_v14, %s2691_s11 }
 0x628   : > { %1608 = vrot.lane.b32.xlu1 %v1603_v15, %s2691_s11  ;;  %v1618_v15 = vld [vmem:[%s2674_s8] sm:$0x1]  ;;  %s1828_s11 = sshll.u32 %s352_s30, 4  ;;  %s2624_s11 = int_to_ptr.vmem [resolvable:$true] %s1828_s11 }
 0x629   : > { %s2125_s21 = scalar_lea.vmem %s2624_s11, 96  ;;  %p2132_p0 = scmp.lt.s32.totalorder %s2624_s11, %s2130_s26 }
 0x62a   : > { %p2126_p11 = scmp.ne.s32.totalorder %s2624_s11, %s2125_s21  ;;  %p2133_p1 = scmp.lt.s32.totalorder %s2131_s28, %s2125_s21 }
 0x62b   : > { %1632 = vperm.xlu0 %2091, %v1629_v16  }
 0x62c   : > { %p2127_p12 = pnand %p2126_p11, %p2296_p5  ;;  %p2134_p2 = por %p2133_p1, %p2132_p0 }
 0x62e   : > { %p2128_p13 = pneg %p2127_p12 }
 0x630   : > { %p2135_p3 = pnand %p2134_p2, %p2128_p13 }
 0x67d   : > { %v1505_v17 = vpop.permute.xlu0 %1504 }
 0x67e   : > { %v1507_v18 = vpop.permute.xlu1 %1506  ;;  %v1508_v19 = vrot.slane %v1505_v17, 4 }
 0x67f   : > { %v1509_v20 = vrot.slane %v1507_v18, 4  ;;  %1515 = vst.msk [vmem:[#allocation3 + $0x14] sm:$0x3] %vm2692_vm1, %v1507_v18  ;;  %vm1810_vm1 = vcmask 553988  }
 0x681   : > { %v1510_v21 = vsel %vm401_vm4, %v1508_v19, %v1509_v20  ;;  %v1539_v23 = vpop.permute.xlu0 %1538  ;;  %v1768_v19 = vld [vmem:[%s2667_s1] sm:$0x7] }
 0x682   : > { %v1511_v22 = vsel %vm421_vm5, %v1505_v17, %v1510_v21  ;;  %v1541_v24 = vpop.permute.xlu1 %1540  ;;  %v1542_v25 = vrot.slane %v1539_v23, 4  ;;  %vm2695_vm5 = vcmask 551938  }
 0x683   : > { %1514 = vst [vmem:[#allocation3 + $0xc] sm:$0x33] %v1511_v22  ;;  %v1543_v26 = vrot.slane %v1541_v24, 4  ;;  %1549 = vst.msk [vmem:[#allocation3 + $0x20] sm:$0x3] %vm2693_vm0, %v1541_v24 }
 0x685   : > { %v1544_v27 = vsel %vm401_vm4, %v1542_v25, %v1543_v26  ;;  %v1573_v1 = vpop.permute.xlu0 %1572  ;;  %v1781_v26 = vrot.slane %v1768_v19, %v2393_v49 }
 0x686   : > { %v1545_v29 = vsel %vm457_vm6, %v1539_v23, %v1544_v27  ;;  %v1575_v30 = vpop.permute.xlu1 %1574  ;;  %v1576_v31 = vrot.slane %v1573_v1, 4  ;;  %vm2696_vm6 = vmmov %vm2695_vm5  ;;  %v1773_v23 = vrot.slane %v1768_v19, %v2384_v42 }
 0x687   : > { %1548 = vst [vmem:[#allocation3 + $0x18] sm:$0x33] %v1545_v29  ;;  %v1577_v32 = vrot.slane %v1575_v30, 4  ;;  %1583 = vst.msk [vmem:[#allocation3 + $0x2c] sm:$0x3] %vm2694_vm2, %v1575_v30  ;;  %v1777_v29 = vrot.slane %v1768_v19, %v2390_v44 }
 0x689   : > { %v1578_v33 = vsel %vm401_vm4, %v1576_v31, %v1577_v32  ;;  %v1489_v35 = vpop.permute.xlu0 %1488 }
 0x68a   : > { %v1579_v34 = vsel %vm493_vm7, %v1573_v1, %v1578_v33  ;;  %v1491_v36 = vpop.permute.xlu1 %1490  ;;  %v1492_v37 = vrot.slane %v1489_v35, 4  ;;  %vm2697_vm7 = vmmov %vm2695_vm5 }
 0x68b   : > { %1582 = vst [vmem:[#allocation3 + $0x24] sm:$0x33] %v1579_v34  ;;  %v1493_v38 = vrot.slane %v1491_v36, 4  ;;  %1499 = vst.msk [vmem:[#allocation3 + $0x8] sm:$0xc] %vm2695_vm5, %v1491_v36 }
 0x68d   : > { %v1494_v39 = vsel %vm401_vm4, %v1492_v37, %v1493_v38  ;;  %v1523_v41 = vpop.permute.xlu0 %1522 }
 0x68e   : > { %v1495_v40 = vsel %vm403_vm11, %v1489_v35, %v1494_v39  ;;  %v1525_v43 = vpop.permute.xlu1 %1524  ;;  %v1526_v45 = vrot.slane %v1523_v41, 4  ;;  %vm2698_vm11 = vmmov %vm2695_vm5 }
 0x68f   : > { %1498 = vst [vmem:[#allocation3] sm:$0xcc] %v1495_v40  ;;  %v1527_v46 = vrot.slane %v1525_v43, 4  ;;  %1533 = vst.msk [vmem:[#allocation3 + $0x14] sm:$0xc] %vm2696_vm6, %v1525_v43 }
 0x691   : > { %v1528_v47 = vsel %vm401_vm4, %v1526_v45, %v1527_v46  ;;  %v1557_v50 = vpop.permute.xlu0 %1556 }
 0x692   : > { %v1529_v48 = vsel %vm440_vm9, %v1523_v41, %v1528_v47  ;;  %v1559_v51 = vpop.permute.xlu1 %1558  ;;  %v1560_v52 = vrot.slane %v1557_v50, 4  ;;  %vm2699_vm9 = vmmov %vm2693_vm0 }
 0x693   : > { %1532 = vst [vmem:[#allocation3 + $0xc] sm:$0xcc] %v1529_v48  ;;  %v1561_v53 = vrot.slane %v1559_v51, 4  ;;  %1567 = vst.msk [vmem:[#allocation3 + $0x20] sm:$0xc] %vm2697_vm7, %v1559_v51 }
 0x695   : > { %v1562_v54 = vsel %vm401_vm4, %v1560_v52, %v1561_v53  ;;  %v1591_v56 = vpop.permute.xlu0 %1590 }
 0x696   : > { %v1563_v55 = vsel %vm476_vm10, %v1557_v50, %v1562_v54  ;;  %v1593_v57 = vpop.permute.xlu1 %1592  ;;  %v2114_v58 = vld [vmem:[#allocation3 + $0x8] ss:$12 sps:$4 sm:$0xff]   ;;  %v1594_v59 = vrot.slane %v1591_v56, 4  ;;  %vm2700_vm10 = vcmask 1041408  }
 0x697   : > { %1566 = vst [vmem:[#allocation3 + $0x18] sm:$0xcc] %v1563_v55  ;;  %v1595_v60 = vrot.slane %v1593_v57, 4  ;;  %1601 = vst.msk [vmem:[#allocation3 + $0x2c] sm:$0xc] %vm2698_vm11, %v1593_v57  ;;  %2027 = vmatpush3.bf16.msra.mxu1 %v2114_v58 }
 0x698   : > { %2028 = vmatprep.subr.bf16.mxu1 %v2196_v28 }
 0x699   : > { %v1596_v61 = vsel %vm401_vm4, %v1594_v59, %v1595_v60  ;;  %v1607_v63 = vpop.permute.xlu0 %1606 }
 0x69a   : > { %v1597_v62 = vsel %vm512_vm12, %v1591_v56, %v1596_v61  ;;  %v1609_v0 = vpop.permute.xlu1 %1608  ;;  %v2115_v4 = vld [vmem:[#allocation3] ss:$12 sps:$4 sm:$0xff]   ;;  %v2117_v2 = vld [vmem:[#allocation3 + $0x4] ss:$12 sps:$4 sm:$0xff]   ;;  %v1610_v3 = vrot.slane %v1607_v63, 4  ;;  %vm2702_vm12 = vcmask 293888  }
 0x69b   : > { %1600 = vst [vmem:[#allocation3 + $0x24] sm:$0xcc] %v1597_v62  ;;  %v1611_v5 = vrot.slane %v1609_v0, 4  ;;  %1617 = vst.msk [vmem:[#allocation3 + $0x38] sm:$0x3] %vm2699_vm9, %v1609_v0  ;;  %1687 = vmatprep.subr.bf16.mxu0 %v2117_v2 }
 0x69c   : > { %1688 = vmatpush1.bf16.msra.mxu0 %v2115_v4  ;;  %vm2704_vm3 = vmmov %vm2702_vm12 }
 0x69d   : > { %v1612_v7 = vsel %vm401_vm4, %v1610_v3, %v1611_v5  ;;  %vm2701_vm4 = vmmov %vm2700_vm10 }
 0x69e   : > { %v1613_v8 = vsel %vm529_vm13, %v1607_v63, %v1612_v7  ;;  %v2118_v9 = vld [vmem:[#allocation3 + $0x20] ss:$12 sps:$4 sm:$0xff]   ;;  %vm2703_vm13 = vmmov %vm2701_vm4 }
 0x69f   : > { %1616 = vst [vmem:[#allocation3 + $0x30] sm:$0x33] %v1613_v8  ;;  %2029 = vmatpush3.bf16.msra.mxu1 %v2118_v9  ;;  %vm2705_vm14 = vmmov %vm2701_vm4 }
 0x6a0   : > { %2030 = vmatprep.subr.bf16.mxu1 %v2196_v28  ;;  %vm1809_vm15 = vmor %vm1808_vm8, %vm2705_vm14 }
 0x6a1   : > { %vm1811_vm0 = vmor %vm1810_vm1, %vm1809_vm15 }
 0x6a2   : > { %v2119_v10 = vld [vmem:[#allocation3 + $0x18] ss:$12 sps:$4 sm:$0xff]   ;;  %v2121_v11 = vld [vmem:[#allocation3 + $0x1c] ss:$12 sps:$4 sm:$0xff]  }
 0x6a3   : > { %v2122_v12 = vld [vmem:[#allocation3 + $0x38] ss:$0 sps:$4 sm:$0x33]   ;;  %1689 = vmatprep.subr.bf16.mxu0 %v2121_v11 }
 0x6a4   : > { %1690 = vmatpush1.bf16.msra.mxu0 %v2119_v10  ;;  %v1685_v13 = vsel %vm2700_vm10, %v2122_v12, 0 }
 0x6a5   : > { %2031 = vmatpush3.bf16.msra.mxu1 %v1685_v13 }
 0x6a6   : > { %v1627_v14 = vld [vmem:[#allocation3 + $0x30] sm:$0x33] }
 0x6a7   : > { %v1954_v16 = vcombine.high %v1627_v14, %v1627_v14  ;;  %v1953_v17 = vcombine.low %v1627_v14, %v1627_v14 }
 0x6a8   : > { %2033 = vmatmul.mubr.msk.bf16.vlgmr.msra.gmra.mrb[12].mxu1 %vm2702_vm12, %v1618_v15 }
 0x6a9   : > { %1956 = vmatprep.subr.msk.bf16.mxu0 %vm2701_vm4, %v1954_v16  ;;  %v1679_v28 = vsel %vm2703_vm13, %v1953_v17, 0 }
 0x6aa   : > { %1692 = vmatpush1.bf16.msra.mxu0 %v1679_v28  ;;  %v1633_v22 = vpop.permute.xlu0 %1632 }
 0x6ad   : > { %1957 = vmatmul.mubr.msk.bf16.vlgmr.msra.gmra.mrb[12].mxu0 %vm2704_vm3, %v1618_v15 }
 0x77b   : > { %v1762_v18 = vpop.f32.mrb[12].mxu1 }
 0x77c   : > { %v2034_v20 = vpop.f32.mrb[13].mxu1  ;;  %v1763_v25 = vadd.f32 %v1762_v18, %v1633_v22 }
 0x77d   : > { %v1765_v21 = vpop.f32.mrb[14].mxu1 }
 0x77e   : > { %v2035_v24 = vpop.f32.mrb[15].mxu1  ;;  %v1787_v35 = vmul.f32 %v1781_v26, %v1763_v25 }
 0x780   : > { %v1721_v27 = vpop.f32.mrb[12].mxu0  ;;  %v1805_v44 = vrot.slane %v1787_v35, %v2319_v6 }
 0x781   : > { %v1722_v1 = vadd.f32 %v1721_v27, %v1633_v22  ;;  %v1723_v30 = vpop.f32.mrb[13].mxu0 }
 0x782   : > { %v1724_v31 = vadd.f32 %v1723_v30, %v1633_v22  ;;  %v1725_v32 = vpop.f32.mrb[14].mxu0 }
 0x783   : > { %v1785_v33 = vmul.f32 %v1773_v23, %v1722_v1  ;;  %v1726_v34 = vpop.f32.mrb[15].mxu0 }
 0x784   : > { %v1786_v42 = vmul.f32 %v1777_v29, %v1724_v31 }
 0x786   : > { %v1791_v36 = vcombine.low %v1785_v33, %v1786_v42 }
 0x788   : > { %v1798_v49 = vrot.slane %v1791_v36, %v2319_v6 }
 0x78a   : > { %v1806_v37 = vcombine.low %v1798_v49, %v1805_v44 }
 0x78c   : > { %1812 = vst.msk [vmem:[%s352_s30] sm:$0x3f] %vm1811_vm0, %v1806_v37 }
 0x78d   : > { %2138 = shalt.err (!%p2135_p3)
}
 0x78e   : > { %s2139_s27 = scalar_lea.hbm %s2622_s20, 96  ;;  %s2143_s12 = scalar_lea.hbm %s2676_s10, 192 }
 0x78f   : > { %p2140_p4 = scmp.ne.s32.totalorder %s2622_s20, %s2139_s27  ;;  %p2144_p9 = scmp.lt.u32.totalorder %s2622_s20, %s2676_s10 }
 0x790   : > { %p2145_p10 = scmp.lt.u32.totalorder %s2143_s12, %s2139_s27  ;;  %p2147_p12 = scmp.lt.u32.totalorder %s2139_s27, %s2622_s20 }
 0x791   : > { %p2141_p7 = pnand %p2140_p4, %p2296_p5 }
 0x792   : > { %p2146_p11 = por %p2145_p10, %p2144_p9 }
 0x793   : > { %p2142_p8 = pneg %p2141_p7 }
 0x794   : > { %p2148_p13 = por %p2147_p12, %p2146_p11 }
 0x796   : > { %p2149_p0 = pnand %p2148_p13, %p2142_p8 }
 0x798   : > { %2152 = shalt.err (!%p2149_p0)
}
 0x799   : > { %2039 = dma.vmem_to_hbm [thread:$0]  (%p2296_p5), %s2624_s11, 96, %s2622_s20, %s1814_s17  }
 0x79a PF: > { %p2045_p1 = scmp.ge.s32.totalorder %s2187_s16, 2  ;;  %s1840_s21 = sand.u32 1, %s2175_s13  }
 0x79b   : > { %s1841_s26 = scalar_lea.sflag [#allocation5], %s1840_s21 }
 0x79c   : > { %p2042_p2 = pnand %p2045_p1, %p2300_p6 }
 0x79e   : > { %2170 = dma.done.wait (!%p2042_p2), %s1841_s26, 96  }
 0x79f   : > { %2172 = vsyncadd (!%p2042_p2), %s1841_s26, 4294967200  ;;  %p20_p3 = scmp.ge.s32.totalorder %s2283_s19, 4   ;;  %s2706_s13 = smov %s2179_s14 }
 0x7a0   : > { %s2707_s14 = smov %s2183_s15  ;;  %s2708_s15 = smov %s2294_s22 }
 0x7a1   : > { %s2709_s16 = smov %s2283_s19  ;;  %22 = sbr.rel (!%p20_p3) target bundleno = 3 (0x3), region = 95 }
 0x7a8   :  { %1846 = vsyncpa [#allocation5], 1 }
 0x7a9   :  { %1848 = vsyncpa [#allocation5 + $0x1], 1 }

</bundles_post_ra>
